<compile_context>
chip_gen: v7x
topology: tpu7x:2x2x1
jax: 0.10.0
libtpu: 0.0.40
codegen_flags: <defaults>
</compile_context>

<pallas_src>
import jax
import jax.numpy as jnp
from jax.experimental import pallas as pl
from jax.experimental.pallas import tpu as pltpu

VMEM = pltpu.MemorySpace.VMEM
SMEM = pltpu.MemorySpace.SMEM


def _sigmoid(z):
    return 1.0 / (1.0 + jnp.exp(-z))


# --------------------------- fused decoder-step kernel ------------------------------
def make_fused_decoder_kernel(L, B, S, E, H, O):
    """Fused: embedding gather + attention + softmax + context + L LSTM cells + fc."""

    def kernel(*refs):
        (ids_ref, h_ref, c_ref, enc_ref, emb_ref,
         wa_h_ref, wa_e_ref, ba_ref, v_ref) = refs[:9]
        pos = 9
        layer_refs = []
        for l in range(L):
            n = 4 if l == 0 else 3          # layer 0 carries split (emb, ctx) W_ih
            layer_refs.append(refs[pos:pos + n])
            pos += n
        fc_w_ref, fc_b_ref = refs[pos], refs[pos + 1]
        pred_ref, h_out_ref, c_out_ref = refs[pos + 2], refs[pos + 3], refs[pos + 4]
        f32 = jnp.float32

        # ---- embedding gather: token ids live in SMEM, table stays in VMEM ----
        # dropout after embedding is identity in eval mode.
        # TODO(synk): train-mode dropout RNG not modeled.
        emb = jnp.concatenate(
            [emb_ref[pl.ds(ids_ref[b], 1), :] for b in range(B)], axis=0)   # [B, E]

        # ---- additive attention -> softmax -> weighted context ----------------
        enc = enc_ref[...]                                                   # [B, S, H]
        h_top = h_ref[L - 1]                                                 # [B, H]
        e_h = jnp.dot(h_top, wa_h_ref[...], preferred_element_type=f32)      # [B, H]
        wa_e_b = jnp.broadcast_to(wa_e_ref[...][None, :, :], (B, H, H))
        e_e = jnp.einsum('bsh,bhk->bsk', enc, wa_e_b,
                         preferred_element_type=f32)                         # [B, S, H]
        energy = jnp.tanh(e_h[:, None, :] + e_e + ba_ref[...][None, :, :])   # [B, S, H]
        scores = jnp.sum(energy * v_ref[...][None, :, :], axis=-1)           # [B, S]
        scores = scores - jnp.max(scores, axis=-1, keepdims=True)
        p = jnp.exp(scores)
        inv = pl.reciprocal(jnp.sum(p, axis=-1, keepdims=True), approx=True)
        attn = p * inv                                                       # [B, S]
        ctx = jnp.einsum('bqs,bsh->bqh', attn[:, None, :], enc,
                         preferred_element_type=f32)[:, 0, :]                # [B, H]

        # ---- stacked LSTM cells (gate-split weights: no sub-128 lane slicing) --
        x = None
        for l in range(L):
            h_l = h_ref[l]                                                   # [B, H]
            c_l = c_ref[l]                                                   # [B, H]
            if l == 0:
                w_e, w_c, w_h, b = layer_refs[0]          # [4,E,H],[4,H,H],[4,H,H],[4,1,H]
                gates = [jnp.dot(emb, w_e[k], preferred_element_type=f32)
                         + jnp.dot(ctx, w_c[k], preferred_element_type=f32)
                         + jnp.dot(h_l, w_h[k], preferred_element_type=f32)
                         + b[k]
                         for k in range(4)]
            else:
                w_i, w_h, b = layer_refs[l]               # [4,H,H],[4,H,H],[4,1,H]
                gates = [jnp.dot(x, w_i[k], preferred_element_type=f32)
                         + jnp.dot(h_l, w_h[k], preferred_element_type=f32)
                         + b[k]
                         for k in range(4)]
            i_g = _sigmoid(gates[0])
            f_g = _sigmoid(gates[1])
            g_g = jnp.tanh(gates[2])
            o_g = _sigmoid(gates[3])
            c_new = f_g * c_l + i_g * g_g
            h_new = o_g * jnp.tanh(c_new)
            h_out_ref[l] = h_new
            c_out_ref[l] = c_new
            x = h_new                                     # inter-layer dropout = identity (eval)

        # ---- fc_out -------------------------------------------------------------
        pred_ref[...] = (jnp.dot(x, fc_w_ref[...], preferred_element_type=f32)
                         + fc_b_ref[...])

    return kernel


# ------------------- one-time parameter preparation (hoisted) -----------------------
def prepare_params(params, embed_dim, hidden_dim):
    E, H = embed_dim, hidden_dim
    prep = {
        'embedding': params['embedding'],                       # [O, E]
        'wa_h': params['attn_w'][:H],                           # [H, H]  (multiplies hidden)
        'wa_e': params['attn_w'][H:],                           # [H, H]  (multiplies enc)
        'ba': params['attn_b'].reshape(1, H),
        'v': params['attn_v'].reshape(1, H),
        'fc_w': params['fc_w'],                                 # [H, O]
        'fc_b': params['fc_b'].reshape(1, -1),                  # [1, O]
        'lstm': [],
    }
    for l, (w_ih, w_hh, b) in enumerate(params['lstm']):
        w_hh_g = w_hh.reshape(H, 4, H).transpose(1, 0, 2)       # [4, H, H]
        b_g = b.reshape(4, 1, H)                                # [4, 1, H]
        if l == 0:
            w_emb = w_ih[:E].reshape(E, 4, H).transpose(1, 0, 2)   # [4, E, H]
            w_ctx = w_ih[E:].reshape(H, 4, H).transpose(1, 0, 2)   # [4, H, H]
            prep['lstm'].append((w_emb, w_ctx, w_hh_g, b_g))
        else:
            w_ih_g = w_ih.reshape(H, 4, H).transpose(1, 0, 2)      # [4, H, H]
            prep['lstm'].append((w_ih_g, w_hh_g, b_g))
    return prep


# ------------------------------- full forward ---------------------------------------
def decoder_forward(prep, token_ids, hidden, cell, encoder_outputs):
    # token_ids: [B] int32; hidden/cell: [L, B, H]; encoder_outputs: [S, B, H]
    L, B, H = hidden.shape
    S = encoder_outputs.shape[0]
    E = prep['embedding'].shape[1]
    O = prep['fc_w'].shape[1]

    # batch-major encoder outputs (constant across decode steps -> hoistable by caller)
    enc_bsh = jnp.transpose(encoder_outputs, (1, 0, 2))          # [B, S, H]

    args = [token_ids, hidden, cell, enc_bsh, prep['embedding'],
            prep['wa_h'], prep['wa_e'], prep['ba'], prep['v']]
    for lw in prep['lstm']:
        args.extend(lw)
    args.extend([prep['fc_w'], prep['fc_b']])

    smem_spec = pl.BlockSpec(memory_space=SMEM)
    vmem_spec = pl.BlockSpec(memory_space=VMEM)

    kernel = make_fused_decoder_kernel(L, B, S, E, H, O)
    pred, h_out, c_out = pl.pallas_call(
        kernel,
        out_shape=(jax.ShapeDtypeStruct((B, O), jnp.float32),
                   jax.ShapeDtypeStruct((L, B, H), jnp.float32),
                   jax.ShapeDtypeStruct((L, B, H), jnp.float32)),
        in_specs=[smem_spec] + [vmem_spec] * (len(args) - 1),
        out_specs=(vmem_spec, vmem_spec, vmem_spec),
    )(*args)
    return pred, h_out, c_out


# ---------------------------- pure-JAX reference ------------------------------------
def decoder_forward_ref(params, token_ids, hidden, cell, encoder_outputs):
    emb = params['embedding'][token_ids]
    enc = jnp.transpose(encoder_outputs, (1, 0, 2))
    B, S, H = enc.shape
    h = hidden[-1]
    h_rep = jnp.broadcast_to(h[:, None, :], (B, S, H))
    cat = jnp.concatenate([h_rep, enc], axis=-1)
    energy = jnp.tanh(cat @ params['attn_w'] + params['attn_b'])
    scores = jnp.sum(energy * params['attn_v'], axis=-1)
    attn = jax.nn.softmax(scores, axis=-1)
    ctx = jnp.einsum('bs,bsh->bh', attn, enc)
    x = jnp.concatenate([emb, ctx], axis=-1)
    new_h, new_c = [], []
    for l, (w_ih, w_hh, b) in enumerate(params['lstm']):
        gates = x @ w_ih + hidden[l] @ w_hh + b
        i, f, g, o = jnp.split(gates, 4, axis=-1)
        c_new = _sigmoid(f) * cell[l] + _sigmoid(i) * jnp.tanh(g)
        h_new = _sigmoid(o) * jnp.tanh(c_new)
        new_h.append(h_new)
        new_c.append(c_new)
        x = h_new
    pred = x @ params['fc_w'] + params['fc_b']
    return pred, jnp.stack(new_h), jnp.stack(new_c)


# ---------------------------- deterministic params ----------------------------------
def init_params(key, output_dim, embed_dim, hidden_dim, n_layers):
    ks = iter(jax.random.split(key, 6 + 3 * n_layers))

    def rnd(shape):
        return 0.1 * jax.random.normal(next(ks), shape, jnp.float32)

    params = {
        'embedding': rnd((output_dim, embed_dim)),
        'attn_w': rnd((2 * hidden_dim, hidden_dim)),   # Linear(2H -> H)
        'attn_b': rnd((hidden_dim,)),
        'attn_v': rnd((hidden_dim,)),                  # Linear(H -> 1, no bias)
        'fc_w': rnd((hidden_dim, output_dim)),
        'fc_b': rnd((output_dim,)),
        'lstm': [],
    }
    for l in range(n_layers):
        in_dim = embed_dim + hidden_dim if l == 0 else hidden_dim
        params['lstm'].append((rnd((in_dim, 4 * hidden_dim)),      # W_ih^T
                               rnd((hidden_dim, 4 * hidden_dim)),  # W_hh^T
                               rnd((4 * hidden_dim,))))            # b_ih + b_hh combined
    return params


if __name__ == "__main__":
    B, S, E, H, O, L = 2, 8, 32, 32, 16, 2   # batch, src_len, embed, hidden, output_dim, n_layers
    key = jax.random.PRNGKey(0)
    k_in, k_h, k_c, k_enc, k_p = jax.random.split(key, 5)

    token_ids = jax.random.randint(k_in, (B,), 0, O)                    # [B] int32
    hidden = jax.random.normal(k_h, (L, B, H), jnp.float32)             # [L, B, H]
    cell = jax.random.normal(k_c, (L, B, H), jnp.float32)               # [L, B, H]
    encoder_outputs = jax.random.normal(k_enc, (S, B, H), jnp.float32)  # [S, B, H]
    params = init_params(k_p, O, E, H, L)
    prep = prepare_params(params, E, H)                                 # hoisted once

    pred, h_new, c_new = decoder_forward(prep, token_ids, hidden, cell, encoder_outputs)
    jax.block_until_ready((pred, h_new, c_new))

    pred_r, h_r, c_r = decoder_forward_ref(params, token_ids, hidden, cell, encoder_outputs)
    assert pred.shape == (B, O) and h_new.shape == (L, B, H) and c_new.shape == (L, B, H)
    # tolerance 1e-3: softmax normalization uses the EUP approximate reciprocal
    assert jnp.allclose(pred, pred_r, atol=1e-3, rtol=1e-3)
    assert jnp.allclose(h_new, h_r, atol=1e-3, rtol=1e-3)
    assert jnp.allclose(c_new, c_r, atol=1e-3, rtol=1e-3)
    print("KERNEL_OK")
</pallas_src>

<mosaic_0001>
module attributes {stable_mosaic.version = 11 : i64} {
  func.func @kernel(%arg0: memref<2xi32, #tpu.memory_space<smem>>, %arg1: memref<2x2x32xf32, #tpu.memory_space<vmem>>, %arg2: memref<2x2x32xf32, #tpu.memory_space<vmem>>, %arg3: memref<2x8x32xf32, #tpu.memory_space<vmem>>, %arg4: memref<16x32xf32, #tpu.memory_space<vmem>>, %arg5: memref<32x32xf32, #tpu.memory_space<vmem>>, %arg6: memref<32x32xf32, #tpu.memory_space<vmem>>, %arg7: memref<1x32xf32, #tpu.memory_space<vmem>>, %arg8: memref<1x32xf32, #tpu.memory_space<vmem>>, %arg9: memref<4x32x32xf32, #tpu.memory_space<vmem>>, %arg10: memref<4x32x32xf32, #tpu.memory_space<vmem>>, %arg11: memref<4x32x32xf32, #tpu.memory_space<vmem>>, %arg12: memref<4x1x32xf32, #tpu.memory_space<vmem>>, %arg13: memref<4x32x32xf32, #tpu.memory_space<vmem>>, %arg14: memref<4x32x32xf32, #tpu.memory_space<vmem>>, %arg15: memref<4x1x32xf32, #tpu.memory_space<vmem>>, %arg16: memref<32x16xf32, #tpu.memory_space<vmem>>, %arg17: memref<1x16xf32, #tpu.memory_space<vmem>>, %arg18: memref<2x16xf32, #tpu.memory_space<vmem>>, %arg19: memref<2x2x32xf32, #tpu.memory_space<vmem>>, %arg20: memref<2x2x32xf32, #tpu.memory_space<vmem>>) attributes {dimension_semantics = [], scalar_prefetch = 0 : i64, scratch_operands = 0 : i64, tpu.core_type = #tpu.core_type<tc>} {
    %c0 = arith.constant 0 : index
    %0 = memref.load %arg0[%c0] : memref<2xi32, #tpu.memory_space<smem>>
    %1 = arith.index_cast %0 : i32 to index
    %c0_0 = arith.constant 0 : index
    %2 = vector.load %arg4[%1, %c0_0] : memref<16x32xf32, #tpu.memory_space<vmem>>, vector<1x32xf32>
    %c1 = arith.constant 1 : index
    %3 = memref.load %arg0[%c1] : memref<2xi32, #tpu.memory_space<smem>>
    %4 = arith.index_cast %3 : i32 to index
    %c0_1 = arith.constant 0 : index
    %5 = vector.load %arg4[%4, %c0_1] : memref<16x32xf32, #tpu.memory_space<vmem>>, vector<1x32xf32>
    %6 = tpu.concatenate %2, %5 in 0 : vector<1x32xf32>, vector<1x32xf32> -> vector<2x32xf32>
    %c0_2 = arith.constant 0 : index
    %c0_3 = arith.constant 0 : index
    %c0_4 = arith.constant 0 : index
    %7 = vector.load %arg3[%c0_2, %c0_3, %c0_4] : memref<2x8x32xf32, #tpu.memory_space<vmem>>, vector<2x8x32xf32>
    %c1_5 = arith.constant 1 : index
    %c0_6 = arith.constant 0 : index
    %c0_7 = arith.constant 0 : index
    %8 = vector.load %arg1[%c1_5, %c0_6, %c0_7] : memref<2x2x32xf32, #tpu.memory_space<vmem>>, vector<1x2x32xf32>
    %9 = vector.shape_cast %8 : vector<1x2x32xf32> to vector<2x32xf32>
    %c0_8 = arith.constant 0 : index
    %c0_9 = arith.constant 0 : index
    %10 = vector.load %arg5[%c0_8, %c0_9] : memref<32x32xf32, #tpu.memory_space<vmem>>, vector<32x32xf32>
    %cst = arith.constant dense<0.000000e+00> : vector<2x32xf32>
    %11 = tpu.matmul %9, %10, %cst {dimension_numbers = #tpu.dot_dimension_numbers<[1], [0], [0], [1], [0, 0, 1, 1], [], []>} : vector<2x32xf32>, vector<32x32xf32>, vector<2x32xf32> -> vector<2x32xf32>
    %c0_10 = arith.constant 0 : index
    %c0_11 = arith.constant 0 : index
    %12 = vector.load %arg6[%c0_10, %c0_11] : memref<32x32xf32, #tpu.memory_space<vmem>>, vector<32x32xf32>
    %13 = vector.shape_cast %12 : vector<32x32xf32> to vector<1x32x32xf32>
    %14 = vector.shape_cast %13 : vector<1x32x32xf32> to vector<1x32x32xf32>
    %15 = vector.broadcast %14 : vector<1x32x32xf32> to vector<2x32x32xf32>
    "tpu.trace_start"() <{level = 10 : i32, message = "bsh,bhk->bsk"}> : () -> ()
    %cst_12 = arith.constant dense<0.000000e+00> : vector<2x8x32xf32>
    %16 = tpu.matmul %7, %15, %cst_12 {dimension_numbers = #tpu.dot_dimension_numbers<[2], [1], [1], [2], [0, 0, 0, 1, 1, 2], [0], [0]>} : vector<2x8x32xf32>, vector<2x32x32xf32>, vector<2x8x32xf32> -> vector<2x8x32xf32>
    "tpu.trace_stop"() : () -> ()
    %17 = vector.shape_cast %11 : vector<2x32xf32> to vector<2x1x32xf32>
    %18 = vector.broadcast %17 : vector<2x1x32xf32> to vector<2x8x32xf32>
    %19 = arith.addf %18, %16 : vector<2x8x32xf32>
    %c0_13 = arith.constant 0 : index
    %c0_14 = arith.constant 0 : index
    %20 = vector.load %arg7[%c0_13, %c0_14] : memref<1x32xf32, #tpu.memory_space<vmem>>, vector<1x32xf32>
    %21 = vector.shape_cast %20 : vector<1x32xf32> to vector<1x1x32xf32>
    %22 = vector.broadcast %21 : vector<1x1x32xf32> to vector<2x8x32xf32>
    %23 = arith.addf %19, %22 : vector<2x8x32xf32>
    %24 = math.tanh %23 : vector<2x8x32xf32>
    %c0_15 = arith.constant 0 : index
    %c0_16 = arith.constant 0 : index
    %25 = vector.load %arg8[%c0_15, %c0_16] : memref<1x32xf32, #tpu.memory_space<vmem>>, vector<1x32xf32>
    %26 = vector.shape_cast %25 : vector<1x32xf32> to vector<1x1x32xf32>
    %27 = vector.broadcast %26 : vector<1x1x32xf32> to vector<2x8x32xf32>
    %28 = arith.mulf %24, %27 : vector<2x8x32xf32>
    %cst_17 = arith.constant dense<0.000000e+00> : vector<2x8xf32>
    %29 = vector.multi_reduction <add>, %28, %cst_17 [2] : vector<2x8x32xf32> to vector<2x8xf32>
    %cst_18 = arith.constant dense<0xFF800000> : vector<2xf32>
    %30 = vector.multi_reduction <maximumf>, %29, %cst_18 [1] : vector<2x8xf32> to vector<2xf32>
    %31 = vector.shape_cast %30 : vector<2xf32> to vector<2x1xf32>
    %32 = vector.broadcast %31 : vector<2x1xf32> to vector<2x8xf32>
    %33 = arith.subf %29, %32 : vector<2x8xf32>
    %34 = math.exp %33 : vector<2x8xf32>
    %cst_19 = arith.constant dense<0.000000e+00> : vector<2xf32>
    %35 = vector.multi_reduction <add>, %34, %cst_19 [1] : vector<2x8xf32> to vector<2xf32>
    %36 = vector.shape_cast %35 : vector<2xf32> to vector<2x1xf32>
    %37 = tpu.reciprocal %36 {approx = true} : vector<2x1xf32> -> vector<2x1xf32>
    %38 = vector.broadcast %37 : vector<2x1xf32> to vector<2x8xf32>
    %39 = arith.mulf %34, %38 : vector<2x8xf32>
    %40 = vector.shape_cast %39 : vector<2x8xf32> to vector<2x1x8xf32>
    "tpu.trace_start"() <{level = 10 : i32, message = "bqs,bsh->bqh"}> : () -> ()
    %cst_20 = arith.constant dense<0.000000e+00> : vector<2x1x32xf32>
    %41 = tpu.matmul %40, %7, %cst_20 {dimension_numbers = #tpu.dot_dimension_numbers<[2], [1], [1], [2], [0, 0, 0, 1, 1, 2], [0], [0]>} : vector<2x1x8xf32>, vector<2x8x32xf32>, vector<2x1x32xf32> -> vector<2x1x32xf32>
    "tpu.trace_stop"() : () -> ()
    %42 = vector.shape_cast %41 : vector<2x1x32xf32> to vector<2x32xf32>
    %c0_21 = arith.constant 0 : index
    %c0_22 = arith.constant 0 : index
    %c0_23 = arith.constant 0 : index
    %43 = vector.load %arg1[%c0_21, %c0_22, %c0_23] : memref<2x2x32xf32, #tpu.memory_space<vmem>>, vector<1x2x32xf32>
    %44 = vector.shape_cast %43 : vector<1x2x32xf32> to vector<2x32xf32>
    %c0_24 = arith.constant 0 : index
    %c0_25 = arith.constant 0 : index
    %c0_26 = arith.constant 0 : index
    %45 = vector.load %arg2[%c0_24, %c0_25, %c0_26] : memref<2x2x32xf32, #tpu.memory_space<vmem>>, vector<1x2x32xf32>
    %46 = vector.shape_cast %45 : vector<1x2x32xf32> to vector<2x32xf32>
    %c0_27 = arith.constant 0 : index
    %c0_28 = arith.constant 0 : index
    %c0_29 = arith.constant 0 : index
    %47 = vector.load %arg9[%c0_27, %c0_28, %c0_29] : memref<4x32x32xf32, #tpu.memory_space<vmem>>, vector<1x32x32xf32>
    %48 = vector.shape_cast %47 : vector<1x32x32xf32> to vector<32x32xf32>
    %cst_30 = arith.constant dense<0.000000e+00> : vector<2x32xf32>
    %49 = tpu.matmul %6, %48, %cst_30 {dimension_numbers = #tpu.dot_dimension_numbers<[1], [0], [0], [1], [0, 0, 1, 1], [], []>} : vector<2x32xf32>, vector<32x32xf32>, vector<2x32xf32> -> vector<2x32xf32>
    %c0_31 = arith.constant 0 : index
    %c0_32 = arith.constant 0 : index
    %c0_33 = arith.constant 0 : index
    %50 = vector.load %arg10[%c0_31, %c0_32, %c0_33] : memref<4x32x32xf32, #tpu.memory_space<vmem>>, vector<1x32x32xf32>
    %51 = vector.shape_cast %50 : vector<1x32x32xf32> to vector<32x32xf32>
    %cst_34 = arith.constant dense<0.000000e+00> : vector<2x32xf32>
    %52 = tpu.matmul %42, %51, %cst_34 {dimension_numbers = #tpu.dot_dimension_numbers<[1], [0], [0], [1], [0, 0, 1, 1], [], []>} : vector<2x32xf32>, vector<32x32xf32>, vector<2x32xf32> -> vector<2x32xf32>
    %53 = arith.addf %49, %52 : vector<2x32xf32>
    %c0_35 = arith.constant 0 : index
    %c0_36 = arith.constant 0 : index
    %c0_37 = arith.constant 0 : index
    %54 = vector.load %arg11[%c0_35, %c0_36, %c0_37] : memref<4x32x32xf32, #tpu.memory_space<vmem>>, vector<1x32x32xf32>
    %55 = vector.shape_cast %54 : vector<1x32x32xf32> to vector<32x32xf32>
    %cst_38 = arith.constant dense<0.000000e+00> : vector<2x32xf32>
    %56 = tpu.matmul %44, %55, %cst_38 {dimension_numbers = #tpu.dot_dimension_numbers<[1], [0], [0], [1], [0, 0, 1, 1], [], []>} : vector<2x32xf32>, vector<32x32xf32>, vector<2x32xf32> -> vector<2x32xf32>
    %57 = arith.addf %53, %56 : vector<2x32xf32>
    %c0_39 = arith.constant 0 : index
    %c0_40 = arith.constant 0 : index
    %c0_41 = arith.constant 0 : index
    %58 = vector.load %arg12[%c0_39, %c0_40, %c0_41] : memref<4x1x32xf32, #tpu.memory_space<vmem>>, vector<1x1x32xf32>
    %59 = vector.shape_cast %58 : vector<1x1x32xf32> to vector<1x32xf32>
    %60 = vector.broadcast %59 : vector<1x32xf32> to vector<2x32xf32>
    %61 = arith.addf %57, %60 : vector<2x32xf32>
    %c1_42 = arith.constant 1 : index
    %c0_43 = arith.constant 0 : index
    %c0_44 = arith.constant 0 : index
    %62 = vector.load %arg9[%c1_42, %c0_43, %c0_44] : memref<4x32x32xf32, #tpu.memory_space<vmem>>, vector<1x32x32xf32>
    %63 = vector.shape_cast %62 : vector<1x32x32xf32> to vector<32x32xf32>
    %cst_45 = arith.constant dense<0.000000e+00> : vector<2x32xf32>
    %64 = tpu.matmul %6, %63, %cst_45 {dimension_numbers = #tpu.dot_dimension_numbers<[1], [0], [0], [1], [0, 0, 1, 1], [], []>} : vector<2x32xf32>, vector<32x32xf32>, vector<2x32xf32> -> vector<2x32xf32>
    %c1_46 = arith.constant 1 : index
    %c0_47 = arith.constant 0 : index
    %c0_48 = arith.constant 0 : index
    %65 = vector.load %arg10[%c1_46, %c0_47, %c0_48] : memref<4x32x32xf32, #tpu.memory_space<vmem>>, vector<1x32x32xf32>
    %66 = vector.shape_cast %65 : vector<1x32x32xf32> to vector<32x32xf32>
    %cst_49 = arith.constant dense<0.000000e+00> : vector<2x32xf32>
    %67 = tpu.matmul %42, %66, %cst_49 {dimension_numbers = #tpu.dot_dimension_numbers<[1], [0], [0], [1], [0, 0, 1, 1], [], []>} : vector<2x32xf32>, vector<32x32xf32>, vector<2x32xf32> -> vector<2x32xf32>
    %68 = arith.addf %64, %67 : vector<2x32xf32>
    %c1_50 = arith.constant 1 : index
    %c0_51 = arith.constant 0 : index
    %c0_52 = arith.constant 0 : index
    %69 = vector.load %arg11[%c1_50, %c0_51, %c0_52] : memref<4x32x32xf32, #tpu.memory_space<vmem>>, vector<1x32x32xf32>
    %70 = vector.shape_cast %69 : vector<1x32x32xf32> to vector<32x32xf32>
    %cst_53 = arith.constant dense<0.000000e+00> : vector<2x32xf32>
    %71 = tpu.matmul %44, %70, %cst_53 {dimension_numbers = #tpu.dot_dimension_numbers<[1], [0], [0], [1], [0, 0, 1, 1], [], []>} : vector<2x32xf32>, vector<32x32xf32>, vector<2x32xf32> -> vector<2x32xf32>
    %72 = arith.addf %68, %71 : vector<2x32xf32>
    %c1_54 = arith.constant 1 : index
    %c0_55 = arith.constant 0 : index
    %c0_56 = arith.constant 0 : index
    %73 = vector.load %arg12[%c1_54, %c0_55, %c0_56] : memref<4x1x32xf32, #tpu.memory_space<vmem>>, vector<1x1x32xf32>
    %74 = vector.shape_cast %73 : vector<1x1x32xf32> to vector<1x32xf32>
    %75 = vector.broadcast %74 : vector<1x32xf32> to vector<2x32xf32>
    %76 = arith.addf %72, %75 : vector<2x32xf32>
    %c2 = arith.constant 2 : index
    %c0_57 = arith.constant 0 : index
    %c0_58 = arith.constant 0 : index
    %77 = vector.load %arg9[%c2, %c0_57, %c0_58] : memref<4x32x32xf32, #tpu.memory_space<vmem>>, vector<1x32x32xf32>
    %78 = vector.shape_cast %77 : vector<1x32x32xf32> to vector<32x32xf32>
    %cst_59 = arith.constant dense<0.000000e+00> : vector<2x32xf32>
    %79 = tpu.matmul %6, %78, %cst_59 {dimension_numbers = #tpu.dot_dimension_numbers<[1], [0], [0], [1], [0, 0, 1, 1], [], []>} : vector<2x32xf32>, vector<32x32xf32>, vector<2x32xf32> -> vector<2x32xf32>
    %c2_60 = arith.constant 2 : index
    %c0_61 = arith.constant 0 : index
    %c0_62 = arith.constant 0 : index
    %80 = vector.load %arg10[%c2_60, %c0_61, %c0_62] : memref<4x32x32xf32, #tpu.memory_space<vmem>>, vector<1x32x32xf32>
    %81 = vector.shape_cast %80 : vector<1x32x32xf32> to vector<32x32xf32>
    %cst_63 = arith.constant dense<0.000000e+00> : vector<2x32xf32>
    %82 = tpu.matmul %42, %81, %cst_63 {dimension_numbers = #tpu.dot_dimension_numbers<[1], [0], [0], [1], [0, 0, 1, 1], [], []>} : vector<2x32xf32>, vector<32x32xf32>, vector<2x32xf32> -> vector<2x32xf32>
    %83 = arith.addf %79, %82 : vector<2x32xf32>
    %c2_64 = arith.constant 2 : index
    %c0_65 = arith.constant 0 : index
    %c0_66 = arith.constant 0 : index
    %84 = vector.load %arg11[%c2_64, %c0_65, %c0_66] : memref<4x32x32xf32, #tpu.memory_space<vmem>>, vector<1x32x32xf32>
    %85 = vector.shape_cast %84 : vector<1x32x32xf32> to vector<32x32xf32>
    %cst_67 = arith.constant dense<0.000000e+00> : vector<2x32xf32>
    %86 = tpu.matmul %44, %85, %cst_67 {dimension_numbers = #tpu.dot_dimension_numbers<[1], [0], [0], [1], [0, 0, 1, 1], [], []>} : vector<2x32xf32>, vector<32x32xf32>, vector<2x32xf32> -> vector<2x32xf32>
    %87 = arith.addf %83, %86 : vector<2x32xf32>
    %c2_68 = arith.constant 2 : index
    %c0_69 = arith.constant 0 : index
    %c0_70 = arith.constant 0 : index
    %88 = vector.load %arg12[%c2_68, %c0_69, %c0_70] : memref<4x1x32xf32, #tpu.memory_space<vmem>>, vector<1x1x32xf32>
    %89 = vector.shape_cast %88 : vector<1x1x32xf32> to vector<1x32xf32>
    %90 = vector.broadcast %89 : vector<1x32xf32> to vector<2x32xf32>
    %91 = arith.addf %87, %90 : vector<2x32xf32>
    %c3 = arith.constant 3 : index
    %c0_71 = arith.constant 0 : index
    %c0_72 = arith.constant 0 : index
    %92 = vector.load %arg9[%c3, %c0_71, %c0_72] : memref<4x32x32xf32, #tpu.memory_space<vmem>>, vector<1x32x32xf32>
    %93 = vector.shape_cast %92 : vector<1x32x32xf32> to vector<32x32xf32>
    %cst_73 = arith.constant dense<0.000000e+00> : vector<2x32xf32>
    %94 = tpu.matmul %6, %93, %cst_73 {dimension_numbers = #tpu.dot_dimension_numbers<[1], [0], [0], [1], [0, 0, 1, 1], [], []>} : vector<2x32xf32>, vector<32x32xf32>, vector<2x32xf32> -> vector<2x32xf32>
    %c3_74 = arith.constant 3 : index
    %c0_75 = arith.constant 0 : index
    %c0_76 = arith.constant 0 : index
    %95 = vector.load %arg10[%c3_74, %c0_75, %c0_76] : memref<4x32x32xf32, #tpu.memory_space<vmem>>, vector<1x32x32xf32>
    %96 = vector.shape_cast %95 : vector<1x32x32xf32> to vector<32x32xf32>
    %cst_77 = arith.constant dense<0.000000e+00> : vector<2x32xf32>
    %97 = tpu.matmul %42, %96, %cst_77 {dimension_numbers = #tpu.dot_dimension_numbers<[1], [0], [0], [1], [0, 0, 1, 1], [], []>} : vector<2x32xf32>, vector<32x32xf32>, vector<2x32xf32> -> vector<2x32xf32>
    %98 = arith.addf %94, %97 : vector<2x32xf32>
    %c3_78 = arith.constant 3 : index
    %c0_79 = arith.constant 0 : index
    %c0_80 = arith.constant 0 : index
    %99 = vector.load %arg11[%c3_78, %c0_79, %c0_80] : memref<4x32x32xf32, #tpu.memory_space<vmem>>, vector<1x32x32xf32>
    %100 = vector.shape_cast %99 : vector<1x32x32xf32> to vector<32x32xf32>
    %cst_81 = arith.constant dense<0.000000e+00> : vector<2x32xf32>
    %101 = tpu.matmul %44, %100, %cst_81 {dimension_numbers = #tpu.dot_dimension_numbers<[1], [0], [0], [1], [0, 0, 1, 1], [], []>} : vector<2x32xf32>, vector<32x32xf32>, vector<2x32xf32> -> vector<2x32xf32>
    %102 = arith.addf %98, %101 : vector<2x32xf32>
    %c3_82 = arith.constant 3 : index
    %c0_83 = arith.constant 0 : index
    %c0_84 = arith.constant 0 : index
    %103 = vector.load %arg12[%c3_82, %c0_83, %c0_84] : memref<4x1x32xf32, #tpu.memory_space<vmem>>, vector<1x1x32xf32>
    %104 = vector.shape_cast %103 : vector<1x1x32xf32> to vector<1x32xf32>
    %105 = vector.broadcast %104 : vector<1x32xf32> to vector<2x32xf32>
    %106 = arith.addf %102, %105 : vector<2x32xf32>
    %cst_85 = arith.constant 0.000000e+00 : f32
    %107 = vector.broadcast %cst_85 : f32 to vector<2x32xf32>
    %108 = arith.subf %107, %61 : vector<2x32xf32>
    %109 = math.exp %108 : vector<2x32xf32>
    %cst_86 = arith.constant 1.000000e+00 : f32
    %110 = vector.broadcast %cst_86 : f32 to vector<2x32xf32>
    %111 = arith.addf %110, %109 : vector<2x32xf32>
    %cst_87 = arith.constant 1.000000e+00 : f32
    %112 = vector.broadcast %cst_87 : f32 to vector<2x32xf32>
    %113 = arith.divf %112, %111 : vector<2x32xf32>
    %cst_88 = arith.constant 0.000000e+00 : f32
    %114 = vector.broadcast %cst_88 : f32 to vector<2x32xf32>
    %115 = arith.subf %114, %76 : vector<2x32xf32>
    %116 = math.exp %115 : vector<2x32xf32>
    %cst_89 = arith.constant 1.000000e+00 : f32
    %117 = vector.broadcast %cst_89 : f32 to vector<2x32xf32>
    %118 = arith.addf %117, %116 : vector<2x32xf32>
    %cst_90 = arith.constant 1.000000e+00 : f32
    %119 = vector.broadcast %cst_90 : f32 to vector<2x32xf32>
    %120 = arith.divf %119, %118 : vector<2x32xf32>
    %121 = math.tanh %91 : vector<2x32xf32>
    %cst_91 = arith.constant 0.000000e+00 : f32
    %122 = vector.broadcast %cst_91 : f32 to vector<2x32xf32>
    %123 = arith.subf %122, %106 : vector<2x32xf32>
    %124 = math.exp %123 : vector<2x32xf32>
    %cst_92 = arith.constant 1.000000e+00 : f32
    %125 = vector.broadcast %cst_92 : f32 to vector<2x32xf32>
    %126 = arith.addf %125, %124 : vector<2x32xf32>
    %cst_93 = arith.constant 1.000000e+00 : f32
    %127 = vector.broadcast %cst_93 : f32 to vector<2x32xf32>
    %128 = arith.divf %127, %126 : vector<2x32xf32>
    %129 = arith.mulf %120, %46 : vector<2x32xf32>
    %130 = arith.mulf %113, %121 : vector<2x32xf32>
    %131 = arith.addf %129, %130 : vector<2x32xf32>
    %132 = math.tanh %131 : vector<2x32xf32>
    %133 = arith.mulf %128, %132 : vector<2x32xf32>
    %c0_94 = arith.constant 0 : index
    %c0_95 = arith.constant 0 : index
    %c0_96 = arith.constant 0 : index
    %134 = vector.load %arg19[%c0_94, %c0_95, %c0_96] : memref<2x2x32xf32, #tpu.memory_space<vmem>>, vector<1x2x32xf32>
    %135 = vector.shape_cast %134 : vector<1x2x32xf32> to vector<2x32xf32>
    %136 = vector.shape_cast %133 : vector<2x32xf32> to vector<1x2x32xf32>
    tpu.vector_store %arg19[%c0_94, %c0_95, %c0_96], %136 {strides = array<i32>} : memref<2x2x32xf32, #tpu.memory_space<vmem>>, vector<1x2x32xf32>,
    %c0_97 = arith.constant 0 : index
    %c0_98 = arith.constant 0 : index
    %c0_99 = arith.constant 0 : index
    %137 = vector.load %arg20[%c0_97, %c0_98, %c0_99] : memref<2x2x32xf32, #tpu.memory_space<vmem>>, vector<1x2x32xf32>
    %138 = vector.shape_cast %137 : vector<1x2x32xf32> to vector<2x32xf32>
    %139 = vector.shape_cast %131 : vector<2x32xf32> to vector<1x2x32xf32>
    tpu.vector_store %arg20[%c0_97, %c0_98, %c0_99], %139 {strides = array<i32>} : memref<2x2x32xf32, #tpu.memory_space<vmem>>, vector<1x2x32xf32>,
    %c1_100 = arith.constant 1 : index
    %c0_101 = arith.constant 0 : index
    %c0_102 = arith.constant 0 : index
    %140 = vector.load %arg1[%c1_100, %c0_101, %c0_102] : memref<2x2x32xf32, #tpu.memory_space<vmem>>, vector<1x2x32xf32>
    %141 = vector.shape_cast %140 : vector<1x2x32xf32> to vector<2x32xf32>
    %c1_103 = arith.constant 1 : index
    %c0_104 = arith.constant 0 : index
    %c0_105 = arith.constant 0 : index
    %142 = vector.load %arg2[%c1_103, %c0_104, %c0_105] : memref<2x2x32xf32, #tpu.memory_space<vmem>>, vector<1x2x32xf32>
    %143 = vector.shape_cast %142 : vector<1x2x32xf32> to vector<2x32xf32>
    %c0_106 = arith.constant 0 : index
    %c0_107 = arith.constant 0 : index
    %c0_108 = arith.constant 0 : index
    %144 = vector.load %arg13[%c0_106, %c0_107, %c0_108] : memref<4x32x32xf32, #tpu.memory_space<vmem>>, vector<1x32x32xf32>
    %145 = vector.shape_cast %144 : vector<1x32x32xf32> to vector<32x32xf32>
    %cst_109 = arith.constant dense<0.000000e+00> : vector<2x32xf32>
    %146 = tpu.matmul %133, %145, %cst_109 {dimension_numbers = #tpu.dot_dimension_numbers<[1], [0], [0], [1], [0, 0, 1, 1], [], []>} : vector<2x32xf32>, vector<32x32xf32>, vector<2x32xf32> -> vector<2x32xf32>
    %c0_110 = arith.constant 0 : index
    %c0_111 = arith.constant 0 : index
    %c0_112 = arith.constant 0 : index
    %147 = vector.load %arg14[%c0_110, %c0_111, %c0_112] : memref<4x32x32xf32, #tpu.memory_space<vmem>>, vector<1x32x32xf32>
    %148 = vector.shape_cast %147 : vector<1x32x32xf32> to vector<32x32xf32>
    %cst_113 = arith.constant dense<0.000000e+00> : vector<2x32xf32>
    %149 = tpu.matmul %141, %148, %cst_113 {dimension_numbers = #tpu.dot_dimension_numbers<[1], [0], [0], [1], [0, 0, 1, 1], [], []>} : vector<2x32xf32>, vector<32x32xf32>, vector<2x32xf32> -> vector<2x32xf32>
    %150 = arith.addf %146, %149 : vector<2x32xf32>
    %c0_114 = arith.constant 0 : index
    %c0_115 = arith.constant 0 : index
    %c0_116 = arith.constant 0 : index
    %151 = vector.load %arg15[%c0_114, %c0_115, %c0_116] : memref<4x1x32xf32, #tpu.memory_space<vmem>>, vector<1x1x32xf32>
    %152 = vector.shape_cast %151 : vector<1x1x32xf32> to vector<1x32xf32>
    %153 = vector.broadcast %152 : vector<1x32xf32> to vector<2x32xf32>
    %154 = arith.addf %150, %153 : vector<2x32xf32>
    %c1_117 = arith.constant 1 : index
    %c0_118 = arith.constant 0 : index
    %c0_119 = arith.constant 0 : index
    %155 = vector.load %arg13[%c1_117, %c0_118, %c0_119] : memref<4x32x32xf32, #tpu.memory_space<vmem>>, vector<1x32x32xf32>
    %156 = vector.shape_cast %155 : vector<1x32x32xf32> to vector<32x32xf32>
    %cst_120 = arith.constant dense<0.000000e+00> : vector<2x32xf32>
    %157 = tpu.matmul %133, %156, %cst_120 {dimension_numbers = #tpu.dot_dimension_numbers<[1], [0], [0], [1], [0, 0, 1, 1], [], []>} : vector<2x32xf32>, vector<32x32xf32>, vector<2x32xf32> -> vector<2x32xf32>
    %c1_121 = arith.constant 1 : index
    %c0_122 = arith.constant 0 : index
    %c0_123 = arith.constant 0 : index
    %158 = vector.load %arg14[%c1_121, %c0_122, %c0_123] : memref<4x32x32xf32, #tpu.memory_space<vmem>>, vector<1x32x32xf32>
    %159 = vector.shape_cast %158 : vector<1x32x32xf32> to vector<32x32xf32>
    %cst_124 = arith.constant dense<0.000000e+00> : vector<2x32xf32>
    %160 = tpu.matmul %141, %159, %cst_124 {dimension_numbers = #tpu.dot_dimension_numbers<[1], [0], [0], [1], [0, 0, 1, 1], [], []>} : vector<2x32xf32>, vector<32x32xf32>, vector<2x32xf32> -> vector<2x32xf32>
    %161 = arith.addf %157, %160 : vector<2x32xf32>
    %c1_125 = arith.constant 1 : index
    %c0_126 = arith.constant 0 : index
    %c0_127 = arith.constant 0 : index
    %162 = vector.load %arg15[%c1_125, %c0_126, %c0_127] : memref<4x1x32xf32, #tpu.memory_space<vmem>>, vector<1x1x32xf32>
    %163 = vector.shape_cast %162 : vector<1x1x32xf32> to vector<1x32xf32>
    %164 = vector.broadcast %163 : vector<1x32xf32> to vector<2x32xf32>
    %165 = arith.addf %161, %164 : vector<2x32xf32>
    %c2_128 = arith.constant 2 : index
    %c0_129 = arith.constant 0 : index
    %c0_130 = arith.constant 0 : index
    %166 = vector.load %arg13[%c2_128, %c0_129, %c0_130] : memref<4x32x32xf32, #tpu.memory_space<vmem>>, vector<1x32x32xf32>
    %167 = vector.shape_cast %166 : vector<1x32x32xf32> to vector<32x32xf32>
    %cst_131 = arith.constant dense<0.000000e+00> : vector<2x32xf32>
    %168 = tpu.matmul %133, %167, %cst_131 {dimension_numbers = #tpu.dot_dimension_numbers<[1], [0], [0], [1], [0, 0, 1, 1], [], []>} : vector<2x32xf32>, vector<32x32xf32>, vector<2x32xf32> -> vector<2x32xf32>
    %c2_132 = arith.constant 2 : index
    %c0_133 = arith.constant 0 : index
    %c0_134 = arith.constant 0 : index
    %169 = vector.load %arg14[%c2_132, %c0_133, %c0_134] : memref<4x32x32xf32, #tpu.memory_space<vmem>>, vector<1x32x32xf32>
    %170 = vector.shape_cast %169 : vector<1x32x32xf32> to vector<32x32xf32>
    %cst_135 = arith.constant dense<0.000000e+00> : vector<2x32xf32>
    %171 = tpu.matmul %141, %170, %cst_135 {dimension_numbers = #tpu.dot_dimension_numbers<[1], [0], [0], [1], [0, 0, 1, 1], [], []>} : vector<2x32xf32>, vector<32x32xf32>, vector<2x32xf32> -> vector<2x32xf32>
    %172 = arith.addf %168, %171 : vector<2x32xf32>
    %c2_136 = arith.constant 2 : index
    %c0_137 = arith.constant 0 : index
    %c0_138 = arith.constant 0 : index
    %173 = vector.load %arg15[%c2_136, %c0_137, %c0_138] : memref<4x1x32xf32, #tpu.memory_space<vmem>>, vector<1x1x32xf32>
    %174 = vector.shape_cast %173 : vector<1x1x32xf32> to vector<1x32xf32>
    %175 = vector.broadcast %174 : vector<1x32xf32> to vector<2x32xf32>
    %176 = arith.addf %172, %175 : vector<2x32xf32>
    %c3_139 = arith.constant 3 : index
    %c0_140 = arith.constant 0 : index
    %c0_141 = arith.constant 0 : index
    %177 = vector.load %arg13[%c3_139, %c0_140, %c0_141] : memref<4x32x32xf32, #tpu.memory_space<vmem>>, vector<1x32x32xf32>
    %178 = vector.shape_cast %177 : vector<1x32x32xf32> to vector<32x32xf32>
    %cst_142 = arith.constant dense<0.000000e+00> : vector<2x32xf32>
    %179 = tpu.matmul %133, %178, %cst_142 {dimension_numbers = #tpu.dot_dimension_numbers<[1], [0], [0], [1], [0, 0, 1, 1], [], []>} : vector<2x32xf32>, vector<32x32xf32>, vector<2x32xf32> -> vector<2x32xf32>
    %c3_143 = arith.constant 3 : index
    %c0_144 = arith.constant 0 : index
    %c0_145 = arith.constant 0 : index
    %180 = vector.load %arg14[%c3_143, %c0_144, %c0_145] : memref<4x32x32xf32, #tpu.memory_space<vmem>>, vector<1x32x32xf32>
    %181 = vector.shape_cast %180 : vector<1x32x32xf32> to vector<32x32xf32>
    %cst_146 = arith.constant dense<0.000000e+00> : vector<2x32xf32>
    %182 = tpu.matmul %141, %181, %cst_146 {dimension_numbers = #tpu.dot_dimension_numbers<[1], [0], [0], [1], [0, 0, 1, 1], [], []>} : vector<2x32xf32>, vector<32x32xf32>, vector<2x32xf32> -> vector<2x32xf32>
    %183 = arith.addf %179, %182 : vector<2x32xf32>
    %c3_147 = arith.constant 3 : index
    %c0_148 = arith.constant 0 : index
    %c0_149 = arith.constant 0 : index
    %184 = vector.load %arg15[%c3_147, %c0_148, %c0_149] : memref<4x1x32xf32, #tpu.memory_space<vmem>>, vector<1x1x32xf32>
    %185 = vector.shape_cast %184 : vector<1x1x32xf32> to vector<1x32xf32>
    %186 = vector.broadcast %185 : vector<1x32xf32> to vector<2x32xf32>
    %187 = arith.addf %183, %186 : vector<2x32xf32>
    %cst_150 = arith.constant 0.000000e+00 : f32
    %188 = vector.broadcast %cst_150 : f32 to vector<2x32xf32>
    %189 = arith.subf %188, %154 : vector<2x32xf32>
    %190 = math.exp %189 : vector<2x32xf32>
    %cst_151 = arith.constant 1.000000e+00 : f32
    %191 = vector.broadcast %cst_151 : f32 to vector<2x32xf32>
    %192 = arith.addf %191, %190 : vector<2x32xf32>
    %cst_152 = arith.constant 1.000000e+00 : f32
    %193 = vector.broadcast %cst_152 : f32 to vector<2x32xf32>
    %194 = arith.divf %193, %192 : vector<2x32xf32>
    %cst_153 = arith.constant 0.000000e+00 : f32
    %195 = vector.broadcast %cst_153 : f32 to vector<2x32xf32>
    %196 = arith.subf %195, %165 : vector<2x32xf32>
    %197 = math.exp %196 : vector<2x32xf32>
    %cst_154 = arith.constant 1.000000e+00 : f32
    %198 = vector.broadcast %cst_154 : f32 to vector<2x32xf32>
    %199 = arith.addf %198, %197 : vector<2x32xf32>
    %cst_155 = arith.constant 1.000000e+00 : f32
    %200 = vector.broadcast %cst_155 : f32 to vector<2x32xf32>
    %201 = arith.divf %200, %199 : vector<2x32xf32>
    %202 = math.tanh %176 : vector<2x32xf32>
    %cst_156 = arith.constant 0.000000e+00 : f32
    %203 = vector.broadcast %cst_156 : f32 to vector<2x32xf32>
    %204 = arith.subf %203, %187 : vector<2x32xf32>
    %205 = math.exp %204 : vector<2x32xf32>
    %cst_157 = arith.constant 1.000000e+00 : f32
    %206 = vector.broadcast %cst_157 : f32 to vector<2x32xf32>
    %207 = arith.addf %206, %205 : vector<2x32xf32>
    %cst_158 = arith.constant 1.000000e+00 : f32
    %208 = vector.broadcast %cst_158 : f32 to vector<2x32xf32>
    %209 = arith.divf %208, %207 : vector<2x32xf32>
    %210 = arith.mulf %201, %143 : vector<2x32xf32>
    %211 = arith.mulf %194, %202 : vector<2x32xf32>
    %212 = arith.addf %210, %211 : vector<2x32xf32>
    %213 = math.tanh %212 : vector<2x32xf32>
    %214 = arith.mulf %209, %213 : vector<2x32xf32>
    %c1_159 = arith.constant 1 : index
    %c0_160 = arith.constant 0 : index
    %c0_161 = arith.constant 0 : index
    %215 = vector.load %arg19[%c1_159, %c0_160, %c0_161] : memref<2x2x32xf32, #tpu.memory_space<vmem>>, vector<1x2x32xf32>
    %216 = vector.shape_cast %215 : vector<1x2x32xf32> to vector<2x32xf32>
    %217 = vector.shape_cast %214 : vector<2x32xf32> to vector<1x2x32xf32>
    tpu.vector_store %arg19[%c1_159, %c0_160, %c0_161], %217 {strides = array<i32>} : memref<2x2x32xf32, #tpu.memory_space<vmem>>, vector<1x2x32xf32>,
    %c1_162 = arith.constant 1 : index
    %c0_163 = arith.constant 0 : index
    %c0_164 = arith.constant 0 : index
    %218 = vector.load %arg20[%c1_162, %c0_163, %c0_164] : memref<2x2x32xf32, #tpu.memory_space<vmem>>, vector<1x2x32xf32>
    %219 = vector.shape_cast %218 : vector<1x2x32xf32> to vector<2x32xf32>
    %220 = vector.shape_cast %212 : vector<2x32xf32> to vector<1x2x32xf32>
    tpu.vector_store %arg20[%c1_162, %c0_163, %c0_164], %220 {strides = array<i32>} : memref<2x2x32xf32, #tpu.memory_space<vmem>>, vector<1x2x32xf32>,
    %c0_165 = arith.constant 0 : index
    %c0_166 = arith.constant 0 : index
    %221 = vector.load %arg16[%c0_165, %c0_166] : memref<32x16xf32, #tpu.memory_space<vmem>>, vector<32x16xf32>
    %cst_167 = arith.constant dense<0.000000e+00> : vector<2x16xf32>
    %222 = tpu.matmul %214, %221, %cst_167 {dimension_numbers = #tpu.dot_dimension_numbers<[1], [0], [0], [1], [0, 0, 1, 1], [], []>} : vector<2x32xf32>, vector<32x16xf32>, vector<2x16xf32> -> vector<2x16xf32>
    %c0_168 = arith.constant 0 : index
    %c0_169 = arith.constant 0 : index
    %223 = vector.load %arg17[%c0_168, %c0_169] : memref<1x16xf32, #tpu.memory_space<vmem>>, vector<1x16xf32>
    %224 = vector.broadcast %223 : vector<1x16xf32> to vector<2x16xf32>
    %225 = arith.addf %222, %224 : vector<2x16xf32>
    %c0_170 = arith.constant 0 : index
    %c0_171 = arith.constant 0 : index
    %226 = vector.load %arg18[%c0_170, %c0_171] : memref<2x16xf32, #tpu.memory_space<vmem>>, vector<2x16xf32>
    tpu.vector_store %arg18[%c0_170, %c0_171], %225 {strides = array<i32>} : memref<2x16xf32, #tpu.memory_space<vmem>>, vector<2x16xf32>,
    return
  }
}

</mosaic_0001>

<bundles_post_ra>
// kernel: tpu_custom_call.1
= control target key start
LH: loop header
LB: loop body
LE: loop exit
PB: predicated region body
PF: predicated region fallthrough
CT: control target
= control target key end

     0   :  { %s4128_s0 = inlined_call_operand.vmem [shape: s32[2], index: 0, kind: input, shape index: {}]   ;;  %s4129_s1 = inlined_call_operand.hbm [shape: f32[2,2,32], index: 1, kind: input, shape index: {}]   ;;  %s4130_s2 = inlined_call_operand.hbm [shape: f32[2,2,32], index: 2, kind: input, shape index: {}]   ;;  %s4131_s3 = inlined_call_operand.hbm [shape: f32[2,8,32], index: 3, kind: input, shape index: {}]   ;;  %s4132_s4 = inlined_call_operand.hbm [shape: f32[16,32], index: 4, kind: input, shape index: {}]   ;;  %s4133_s5 = inlined_call_operand.vmem [shape: f32[32,32], index: 5, kind: input, shape index: {}]   ;;  %s4134_s6 = inlined_call_operand.vmem [shape: f32[32,32], index: 6, kind: input, shape index: {}]   ;;  %s4135_s7 = inlined_call_operand.hbm [shape: f32[1,32], index: 7, kind: input, shape index: {}]   ;;  %s4136_s8 = inlined_call_operand.hbm [shape: f32[1,32], index: 8, kind: input, shape index: {}]   ;;  %s4137_s9 = inlined_call_operand.hbm [shape: f32[4,32,32], index: 9, kind: input, shape index: {}]   ;;  %s4138_s10 = inlined_call_operand.hbm [shape: f32[4,32,32], index: 10, kind: input, shape index: {}]   ;;  %s4139_s11 = inlined_call_operand.hbm [shape: f32[4,32,32], index: 11, kind: input, shape index: {}]   ;;  %s4140_s12 = inlined_call_operand.vmem [shape: f32[4,1,32], index: 12, kind: input, shape index: {}]   ;;  %s4141_s13 = inlined_call_operand.hbm [shape: f32[4,32,32], index: 13, kind: input, shape index: {}]   ;;  %s4142_s14 = inlined_call_operand.hbm [shape: f32[4,32,32], index: 14, kind: input, shape index: {}]   ;;  %s4143_s15 = inlined_call_operand.vmem [shape: f32[4,1,32], index: 15, kind: input, shape index: {}]   ;;  %s4144_s16 = inlined_call_operand.vmem [shape: f32[32,16], index: 16, kind: input, shape index: {}]   ;;  %s4145_s17 = inlined_call_operand.vmem [shape: f32[1,16], index: 17, kind: input, shape index: {}]   ;;  %s4146_s18 = inlined_call_operand.hbm [shape: f32[2,16], index: 18, kind: output, shape index: {0}]   ;;  %s4147_s19 = inlined_call_operand.hbm [shape: f32[2,2,32], index: 19, kind: output, shape index: {1}]   ;;  %s4148_s20 = inlined_call_operand.hbm [shape: f32[2,2,32], index: 20, kind: output, shape index: {2}]  }
   0x1   :  { %4155 = sst [smem:[#allocation35_spill]] %s4128_s0 }
   0x2   :  { %4156 = sst [smem:[#allocation36_spill]] %s4129_s1 }
   0x3   :  { %4157 = sst [smem:[#allocation37_spill]] %s4130_s2 }
   0x4   :  { %4158 = sst [smem:[#allocation38_spill]] %s4131_s3 }
   0x5   :  { %4159 = sst [smem:[#allocation39_spill]] %s4132_s4 }
   0x6   :  { %4160 = sst [smem:[#allocation40_spill]] %s4145_s17 }
   0x7   :  { %4161 = sst [smem:[#allocation41_spill]] %s4146_s18 }
   0x8   :  { %4162 = sst [smem:[#allocation42_spill]] %s4148_s20 }
   0x9   :  { %26 = vsyncpa [#allocation5], 0 }
   0xa   :  { %27 = vsyncpa [#allocation3], 0 }
   0xb   :  { %28 = vsyncpa [#allocation8], 0 }
   0xc   :  { %29 = vsyncpa [#allocation11], 0 }
   0xd   :  { %30 = vsyncpa [#allocation14], 0 }
   0xe   :  { %31 = vsyncpa [#allocation17], 0 }
   0xf   :  { %32 = vsyncpa [#allocation20], 0 }
  0x10   :  { %33 = vsyncpa [#allocation4], 0 }
  0x11   :  { %34 = vsyncpa [#allocation24], 0  ;;  %s3537_s1 = smov [#allocation7]   ;;  %s4163_s2 = sld [smem:[#allocation37_spill]] }
  0x12   :  { %s62_s22 = sshll.u32 %s3537_s1, 4  ;;  %s63_s22 = int_to_ptr.vmem [resolvable:$true] %s62_s22 }
  0x17   :  { %s3199_s25 = scalar_lea.hbm %s4163_s2, 64 }
  0x18   :  { %p3200_p0 = scmp.ne.s32.totalorder %s4163_s2, %s3199_s25  ;;  %p3203_p1 = scmp.lt.u32.totalorder %s3199_s25, %s4163_s2 }
  0x1a   :  { %p3205_p2 = pnand %p3203_p1, %p3200_p0 }
  0x1c   :  { %3208 = shalt.err (!%p3205_p2)
}
  0x1d   :  { %s3209_s4 = scalar_lea.vmem %s63_s22, 64  ;;  %p3214_p4 = scmp.lt.s32.totalorder %s63_s22, %s63_s22 }
  0x1e   :  { %p3210_p3 = scmp.ne.s32.totalorder %s63_s22, %s3209_s4  ;;  %p3215_p5 = scmp.lt.s32.totalorder %s3209_s4, %s3209_s4 }
  0x20   :  { %p3216_p6 = por %p3215_p5, %p3214_p4 }
  0x22   :  { %p3217_p7 = pnand %p3216_p6, %p3210_p3 }
  0x24   :  { %3220 = shalt.err (!%p3217_p7)
}
  0x25   :  { %s3538_s29 = smov 32   ;;  %s3539_s30 = smov 2  }
  0x26   :  { %68 = dma.hbm_to_vmem [thread:$0]  %s4163_s2, 64, %s63_s22, [#allocation8], %s3538_s29, %s3538_s29, %s3539_s30  }
  0x27   :  { %s3540_s1 = smov [#allocation10]   ;;  %s3541_s24 = smov [#allocation13]  }
  0x28   :  { %s86_s23 = sshll.u32 %s3540_s1, 4  ;;  %s113_s25 = sshll.u32 %s3541_s24, 4  ;;  %s87_s23 = int_to_ptr.vmem [resolvable:$true] %s86_s23  ;;  %s114_s25 = int_to_ptr.vmem [resolvable:$true] %s113_s25 }
  0x29   :  { %s4164_s27 = sld [smem:[#allocation39_spill]] }
  0x2f   :  { %s3221_s28 = scalar_lea.hbm %s4164_s27, 256 }
  0x30   :  { %p3222_p8 = scmp.ne.s32.totalorder %s4164_s27, %s3221_s28  ;;  %p3225_p9 = scmp.lt.u32.totalorder %s3221_s28, %s4164_s27 }
  0x32   :  { %p3227_p10 = pnand %p3225_p9, %p3222_p8 }
  0x34   :  { %3230 = shalt.err (!%p3227_p10)
}
  0x35   :  { %s3231_s22 = scalar_lea.vmem %s87_s23, 256  ;;  %p3236_p12 = scmp.lt.s32.totalorder %s87_s23, %s87_s23 }
  0x36   :  { %p3232_p11 = scmp.ne.s32.totalorder %s87_s23, %s3231_s22  ;;  %p3237_p13 = scmp.lt.s32.totalorder %s3231_s22, %s3231_s22 }
  0x38   :  { %p3238_p0 = por %p3237_p13, %p3236_p12 }
  0x3a   :  { %p3239_p1 = pnand %p3238_p0, %p3232_p11 }
  0x3c   :  { %3242 = shalt.err (!%p3239_p1)
}
  0x3d   :  { %s3542_s2 = smov 128   ;;  %s3543_s0 = smov 8  }
  0x3e   :  { %92 = dma.hbm_to_vmem [thread:$0]  %s4164_s27, 256, %s87_s23, [#allocation11], %s3542_s2, %s3542_s2, %s3543_s0  }
  0x3f   :  { %s3243_s1 = scalar_lea.hbm %s4136_s8, 16 }
  0x40   :  { %p3244_p2 = scmp.ne.s32.totalorder %s4136_s8, %s3243_s1  ;;  %p3247_p3 = scmp.lt.u32.totalorder %s3243_s1, %s4136_s8 }
  0x42   :  { %p3249_p4 = pnand %p3247_p3, %p3244_p2 }
  0x44   :  { %3252 = shalt.err (!%p3249_p4)
}
  0x45   :  { %s3253_s4 = scalar_lea.vmem %s114_s25, 16  ;;  %s3257_s22 = scalar_lea.vmem %s114_s25, 32 }
  0x46   :  { %p3254_p5 = scmp.ne.s32.totalorder %s114_s25, %s3253_s4  ;;  %p3258_p6 = scmp.lt.s32.totalorder %s114_s25, %s114_s25 }
  0x47   :  { %p3259_p7 = scmp.lt.s32.totalorder %s3257_s22, %s3253_s4 }
  0x49   :  { %p3260_p8 = por %p3259_p7, %p3258_p6 }
  0x4b   :  { %p3261_p9 = pnand %p3260_p8, %p3254_p5 }
  0x4d   :  { %3264 = shalt.err (!%p3261_p9)
}
  0x4e   :  { %116 = dma.hbm_to_vmem [thread:$0]  %s4136_s8, 16, %s114_s25, [#allocation14]  }
  0x4f   :  { %s3544_s18 = smov [#allocation16]   ;;  %s3545_s17 = smov [#allocation19]  }
  0x50   :  { %s134_s21 = sshll.u32 %s3544_s18, 4  ;;  %s160_s20 = sshll.u32 %s3545_s17, 4  ;;  %s135_s21 = int_to_ptr.vmem [resolvable:$true] %s134_s21  ;;  %s161_s20 = int_to_ptr.vmem [resolvable:$true] %s160_s20 }
  0x51   :  { %s3265_s3 = scalar_lea.hbm %s4138_s10, 2048 }
  0x52   :  { %p3266_p10 = scmp.ne.s32.totalorder %s4138_s10, %s3265_s3  ;;  %p3269_p11 = scmp.lt.u32.totalorder %s3265_s3, %s4138_s10 }
  0x54   :  { %p3271_p12 = pnand %p3269_p11, %p3266_p10 }
  0x56   :  { %3274 = shalt.err (!%p3271_p12)
}
  0x57   :  { %s3275_s8 = scalar_lea.vmem %s135_s21, 2048  ;;  %p3280_p0 = scmp.lt.s32.totalorder %s135_s21, %s135_s21 }
  0x58   :  { %p3276_p13 = scmp.ne.s32.totalorder %s135_s21, %s3275_s8  ;;  %p3281_p1 = scmp.lt.s32.totalorder %s3275_s8, %s3275_s8 }
  0x5a   :  { %p3282_p2 = por %p3281_p1, %p3280_p0 }
  0x5c   :  { %p3283_p3 = pnand %p3282_p2, %p3276_p13 }
  0x5e   :  { %3286 = shalt.err (!%p3283_p3)
}
  0x5f   :  { %140 = dma.hbm_to_vmem [thread:$0]  %s4138_s10, 2048, %s135_s21, [#allocation17], %s3542_s2, %s3542_s2, %s3543_s0  }
  0x60   :  { %s4165_s17 = sld [smem:[#allocation35_spill]]  ;;  %s3287_s26 = scalar_lea.hbm %s4141_s13, 2048 }
  0x61   :  { %p3288_p4 = scmp.ne.s32.totalorder %s4141_s13, %s3287_s26  ;;  %p3291_p5 = scmp.lt.u32.totalorder %s3287_s26, %s4141_s13 }
  0x63   :  { %p3293_p6 = pnand %p3291_p5, %p3288_p4 }
  0x66   :  { %s41_s1 = sshll.u32 %s4165_s17, 4  ;;  %s42_s1 = int_to_ptr.vmem [resolvable:$true] %s41_s1 }
  0x67   :  { %3296 = shalt.err (!%p3293_p6)
}
  0x68   :  { %s3297_s10 = scalar_lea.vmem %s161_s20, 2048  ;;  %p3302_p8 = scmp.lt.s32.totalorder %s161_s20, %s161_s20 }
  0x69   :  { %p3298_p7 = scmp.ne.s32.totalorder %s161_s20, %s3297_s10  ;;  %p3303_p9 = scmp.lt.s32.totalorder %s3297_s10, %s3297_s10 }
  0x6b   :  { %p3304_p10 = por %p3303_p9, %p3302_p8 }
  0x6d   :  { %p3305_p11 = pnand %p3304_p10, %p3298_p7 }
  0x6f   :  { %3308 = shalt.err (!%p3305_p11)
}
  0x70   :  { %166 = dma.hbm_to_vmem [thread:$0]  %s4141_s13, 2048, %s161_s20, [#allocation20], %s3542_s2, %s3542_s2, %s3543_s0  }
  0x71   :  { %s3309_s23 = scalar_lea.vmem %s42_s1, 16  ;;  %p3314_p13 = scmp.lt.s32.totalorder %s42_s1, %s42_s1 }
  0x72   :  { %p3310_p12 = scmp.ne.s32.totalorder %s42_s1, %s3309_s23  ;;  %p3315_p0 = scmp.lt.s32.totalorder %s3309_s23, %s3309_s23 }
  0x74   :  { %p3316_p1 = por %p3315_p0, %p3314_p13 }
  0x76   :  { %p3317_p2 = pnand %p3316_p1, %p3310_p12 }
  0x78   :  { %3320 = shalt.err (!%p3317_p2)
}
  0x79   :  { %s3546_s27 = smov [#allocation2]   ;;  %s3547_s18 = smov [#allocation6]  }
  0x7a   :  { %44 = dma.vmem_to_smem %s42_s1, 16, %s3546_s27, [#allocation5]  }
  0x7b   :  { %s50_s17 = sshll.u32 %s3547_s18, 4  ;;  %s3548_s24 = smov [#allocation9]   ;;  %s51_s17 = int_to_ptr.vmem [resolvable:$true] %s50_s17 }
  0x7c   :  { %s74_s3 = sshll.u32 %s3548_s24, 4  ;;  %s4166_s13 = sld [smem:[#allocation36_spill]]  ;;  %s3741_s3 = int_to_ptr.vmem [resolvable:$true] %s74_s3 }
  0x82   :  { %s3321_s20 = scalar_lea.hbm %s4166_s13, 64 }
  0x83   :  { %p3322_p3 = scmp.ne.s32.totalorder %s4166_s13, %s3321_s20  ;;  %p3325_p4 = scmp.lt.u32.totalorder %s3321_s20, %s4166_s13 }
  0x85   :  { %p3327_p5 = pnand %p3325_p4, %p3322_p3 }
  0x87   :  { %3330 = shalt.err (!%p3327_p5)
}
  0x88   :  { %s3331_s1 = scalar_lea.vmem %s51_s17, 64  ;;  %p3336_p7 = scmp.lt.s32.totalorder %s51_s17, %s51_s17 }
  0x89   :  { %p3332_p6 = scmp.ne.s32.totalorder %s51_s17, %s3331_s1  ;;  %p3337_p8 = scmp.lt.s32.totalorder %s3331_s1, %s3331_s1 }
  0x8b   :  { %p3338_p9 = por %p3337_p8, %p3336_p7 }
  0x8d   :  { %p3339_p10 = pnand %p3338_p9, %p3332_p6 }
  0x8f   :  { %3342 = shalt.err (!%p3339_p10)
}
  0x90   :  { %56 = dma.hbm_to_vmem [thread:$0]  %s4166_s13, 64, %s51_s17, [#allocation3], %s3538_s29, %s3538_s29, %s3539_s30  }
  0x91   :  { %s4167_s18 = sld [smem:[#allocation38_spill]] }
  0x97   :  { %s3343_s24 = scalar_lea.hbm %s4167_s18, 256 }
  0x98   :  { %p3344_p11 = scmp.ne.s32.totalorder %s4167_s18, %s3343_s24  ;;  %p3347_p12 = scmp.lt.u32.totalorder %s3343_s24, %s4167_s18 }
  0x9a   :  { %p3349_p13 = pnand %p3347_p12, %p3344_p11 }
  0x9c   :  { %3352 = shalt.err (!%p3349_p13)
}
  0x9d   :  { %s3353_s22 = scalar_lea.vmem %s3741_s3, 256  ;;  %p3358_p1 = scmp.lt.s32.totalorder %s3741_s3, %s3741_s3 }
  0x9e   :  { %p3354_p0 = scmp.ne.s32.totalorder %s3741_s3, %s3353_s22  ;;  %p3359_p2 = scmp.lt.s32.totalorder %s3353_s22, %s3353_s22 }
  0xa0   :  { %p3360_p3 = por %p3359_p2, %p3358_p1 }
  0xa2   :  { %p3361_p4 = pnand %p3360_p3, %p3354_p0 }
  0xa4   :  { %3364 = shalt.err (!%p3361_p4)
}
  0xa5   :  { %80 = dma.hbm_to_vmem [thread:$0]  %s4167_s18, 256, %s3741_s3, [#allocation8], %s3542_s2, %s3542_s2, %s3543_s0  }
  0xa6   :  { %s3549_s8 = smov [#allocation12]   ;;  %s3550_s1 = smov [#allocation15]  }
  0xa7   :  { %s103_s10 = sshll.u32 %s3549_s8, 4  ;;  %s122_s21 = sshll.u32 %s3550_s1, 4  ;;  %s104_s10 = int_to_ptr.vmem [resolvable:$true] %s103_s10  ;;  %s3778_s21 = int_to_ptr.vmem [resolvable:$true] %s122_s21 }
  0xa8   :  { %s3365_s27 = scalar_lea.hbm %s4135_s7, 16 }
  0xa9   :  { %p3366_p5 = scmp.ne.s32.totalorder %s4135_s7, %s3365_s27  ;;  %p3369_p6 = scmp.lt.u32.totalorder %s3365_s27, %s4135_s7 }
  0xab   :  { %p3371_p7 = pnand %p3369_p6, %p3366_p5 }
  0xad   :  { %3374 = shalt.err (!%p3371_p7)
}
  0xae   :  { %s3375_s3 = scalar_lea.vmem %s104_s10, 16  ;;  %s3379_s18 = scalar_lea.vmem %s104_s10, 32 }
  0xaf   :  { %p3376_p8 = scmp.ne.s32.totalorder %s104_s10, %s3375_s3  ;;  %p3380_p9 = scmp.lt.s32.totalorder %s104_s10, %s104_s10 }
  0xb0   :  { %p3381_p10 = scmp.lt.s32.totalorder %s3379_s18, %s3375_s3 }
  0xb2   :  { %p3382_p11 = por %p3381_p10, %p3380_p9 }
  0xb4   :  { %p3383_p12 = pnand %p3382_p11, %p3376_p8 }
  0xb6   :  { %3386 = shalt.err (!%p3383_p12)
}
  0xb7   :  { %106 = dma.hbm_to_vmem [thread:$0]  %s4135_s7, 16, %s104_s10, [#allocation11]  }
  0xb8   :  { %s3387_s8 = scalar_lea.hbm %s4137_s9, 2048 }
  0xb9   :  { %p3388_p13 = scmp.ne.s32.totalorder %s4137_s9, %s3387_s8  ;;  %p3391_p0 = scmp.lt.u32.totalorder %s3387_s8, %s4137_s9 }
  0xbb   :  { %p3393_p1 = pnand %p3391_p0, %p3388_p13 }
  0xbd   :  { %3396 = shalt.err (!%p3393_p1)
}
  0xbe   :  { %s3397_s24 = scalar_lea.vmem %s3778_s21, 2048  ;;  %p3402_p3 = scmp.lt.s32.totalorder %s3778_s21, %s3778_s21 }
  0xbf   :  { %p3398_p2 = scmp.ne.s32.totalorder %s3778_s21, %s3397_s24  ;;  %p3403_p4 = scmp.lt.s32.totalorder %s3397_s24, %s3397_s24 }
  0xc1   :  { %p3404_p5 = por %p3403_p4, %p3402_p3 }
  0xc3   :  { %p3405_p6 = pnand %p3404_p5, %p3398_p2 }
  0xc5   :  { %3408 = shalt.err (!%p3405_p6)
}
  0xc6   :  { %128 = dma.hbm_to_vmem [thread:$0]  %s4137_s9, 2048, %s3778_s21, [#allocation14], %s3542_s2, %s3542_s2, %s3543_s0  }
  0xc7   :  { %s3551_s26 = smov [#allocation18]   ;;  %s3552_s20 = smov [#allocation21]  }
  0xc8   :  { %s146_s28 = sshll.u32 %s3551_s26, 4  ;;  %s172_s3 = sshll.u32 %s3552_s20, 4  ;;  %s147_s28 = int_to_ptr.vmem [resolvable:$true] %s146_s28  ;;  %s3812_s3 = int_to_ptr.vmem [resolvable:$true] %s172_s3 }
  0xc9   :  { %s3409_s22 = scalar_lea.hbm %s4139_s11, 2048 }
  0xca   :  { %p3410_p7 = scmp.ne.s32.totalorder %s4139_s11, %s3409_s22  ;;  %p3413_p8 = scmp.lt.u32.totalorder %s3409_s22, %s4139_s11 }
  0xcc   :  { %p3415_p9 = pnand %p3413_p8, %p3410_p7 }
  0xce   :  { %3418 = shalt.err (!%p3415_p9)
}
  0xcf   :  { %s3419_s9 = scalar_lea.vmem %s147_s28, 2048  ;;  %p3424_p11 = scmp.lt.s32.totalorder %s147_s28, %s147_s28 }
  0xd0   :  { %p3420_p10 = scmp.ne.s32.totalorder %s147_s28, %s3419_s9  ;;  %p3425_p12 = scmp.lt.s32.totalorder %s3419_s9, %s3419_s9 }
  0xd2   :  { %p3426_p13 = por %p3425_p12, %p3424_p11 }
  0xd4   :  { %p3427_p0 = pnand %p3426_p13, %p3420_p10 }
  0xd6   :  { %3430 = shalt.err (!%p3427_p0)
}
  0xd7   :  { %152 = dma.hbm_to_vmem [thread:$0]  %s4139_s11, 2048, %s147_s28, [#allocation17], %s3542_s2, %s3542_s2, %s3543_s0  }
  0xd8   :  { %s3431_s24 = scalar_lea.hbm %s4142_s14, 2048 }
  0xd9   :  { %p3432_p1 = scmp.ne.s32.totalorder %s4142_s14, %s3431_s24  ;;  %p3435_p2 = scmp.lt.u32.totalorder %s3431_s24, %s4142_s14 }
  0xdb   :  { %p3437_p3 = pnand %p3435_p2, %p3432_p1 }
  0xdd   :  { %3440 = shalt.err (!%p3437_p3)
}
  0xde   :  { %s3441_s18 = scalar_lea.vmem %s3812_s3, 2048  ;;  %p3446_p5 = scmp.lt.s32.totalorder %s3812_s3, %s3812_s3 }
  0xdf   :  { %p3442_p4 = scmp.ne.s32.totalorder %s3812_s3, %s3441_s18  ;;  %p3447_p6 = scmp.lt.s32.totalorder %s3441_s18, %s3441_s18 }
  0xe1   :  { %p3448_p7 = por %p3447_p6, %p3446_p5 }
  0xe3   :  { %p3449_p8 = pnand %p3448_p7, %p3442_p4 }
  0xe5   :  { %3452 = shalt.err (!%p3449_p8)
}
  0xe6   :  { %178 = dma.hbm_to_vmem [thread:$0]  %s4142_s14, 2048, %s3812_s3, [#allocation20], %s3542_s2, %s3542_s2, %s3543_s0  }
  0xe7   :  { %3519 = dma.done.wait [#allocation5], 16  }
  0xe8   :  { %3520 = vsyncadd [#allocation5], 4294967280 }
  0xe9   :  { %3521 = dma.done.wait [#allocation3], 64  }
  0xea   :  { %3522 = vsyncadd [#allocation3], 4294967232 }
  0xeb   :  { %3523 = dma.done.wait [#allocation8], 320  }
  0xec   :  { %3524 = vsyncadd [#allocation8], 4294966976 }
  0xed   :  { %3525 = dma.done.wait [#allocation11], 272  }
  0xee   :  { %3526 = vsyncadd [#allocation11], 4294967024 }
  0xef   :  { %3527 = dma.done.wait [#allocation14], 2064  }
  0xf0   :  { %3528 = vsyncadd [#allocation14], 4294965232 }
  0xf1   :  { %3529 = dma.done.wait [#allocation17], 4096  }
  0xf2   :  { %3530 = vsyncadd [#allocation17], 4294963200 }
  0xf3   :  { %3531 = dma.done.wait [#allocation20], 4096  }
  0xf4   :  { %3532 = vsyncadd [#allocation20], 4294963200 }
  0xf5   :  { %221 = sfence }
  0xf6   :  { %v237_v0 = vld [vmem:[%s4133_s5] sm:$0xff]  ;;  %v238_v1 = vld [vmem:[%s4133_s5 + $0x8] sm:$0xff]  ;;  %v239_v2 = vld [vmem:[%s4133_s5 + $0x10] sm:$0xff]  ;;  %v3553_v3 = vmov 0.0|0.0   ;;  %vm3554_vm0 = vmmov 0   ;;  %v3555_v9 = vmov 0.0   ;;  %v469_v19 = vlaneseq }
  0xf7   :  { %2987 = vmatprep.subr.bf16.mxu0 %v3553_v3  ;;  %v2988_v4 = vpack.c.bf16 %v238_v1, %v237_v0  ;;  %v240_v5 = vld [vmem:[%s4133_s5 + $0x18] sm:$0xff]  ;;  %2993 = vmatprep.subr.bf16.mxu1 %v3553_v3  ;;  %v315_v6 = vld [vmem:[%s4134_s6] sm:$0xff]  ;;  %v316_v7 = vld [vmem:[%s4134_s6 + $0x8] sm:$0xff]  ;;  %vm241_vm1 = vcmask 261120   ;;  %v3556_v17 = vmov 1966171168  }
  0xf8   :  { %v2994_v8 = vpack.c.bf16 %v316_v7, %v315_v6  ;;  %2721 = vmatprep.mubr.msk.f32.mxu0 %vm3554_vm0, %v3555_v9  ;;  %v317_v10 = vld [vmem:[%s4134_s6 + $0x10] sm:$0xff]  ;;  %v318_v11 = vld [vmem:[%s4134_s6 + $0x18] sm:$0xff]  ;;  %2732 = vmatprep.mubr.msk.f32.mxu1 %vm3554_vm0, %v3555_v9  ;;  %v2991_v12 = vpack.c.bf16 %v240_v5, %v239_v2  ;;  %v236_v14 = vld [vmem:[#allocation6 + $0x2] sm:$0x3]  ;;  %v467_v18 = vunpack.c.l.s4 %v3556_v17  ;;  %v3898_v21 = vshrl.u32 %v469_v19, 7  ;;  %s2545_s6 = sld [smem:[#allocation2 + $0x1]] }
  0xf9   :  { %2989 = vmatpush3.bf16.msra.mxu0 %v2988_v4  ;;  %v2997_v13 = vpack.c.bf16 %v318_v11, %v317_v10  ;;  %v233_v15 = vld [vmem:[#allocation9] sm:$0xff]  ;;  %v3891_v16 = vld [vmem:[#allocation9 + $0x8] sm:$0xff]  ;;  %v529_v48 = vand.u32 127, %v469_v19  ;;  %vm538_vm2 = vcmask 1041409   ;;  %vm541_vm3 = vcmask 58368   ;;  %s222_s24 = sld [smem:[#allocation2]] }
  0xfa   :  { %2990 = vmatprep.subr.bf16.mxu0 %v3553_v3  ;;  %2995 = vmatpush3.bf16.msra.mxu1 %v2994_v8  ;;  %v468_v20 = vunpack.c.0.s8 %v467_v18  ;;  %v3902_v27 = vsub.s32 0, %v3898_v21  ;;  %v2549_v33 = vld [vmem:[#allocation12] ss:$0 sm:$0xff]  ;;  %v2550_v41 = vld [vmem:[#allocation13] ss:$0 sm:$0xff]  ;;  %v3557_v56 = vmov 0  }
  0xfb   :  { %2996 = vmatprep.subr.bf16.mxu1 %v3553_v3  ;;  %v532_v50 = vsub.s32 %v529_v48, %v3898_v21  ;;  %3156 = vset.pattern.permute.xlu0 %v3557_v56  ;;  %v552_v57 = vsub.s32 1, %v3898_v21  ;;  %vm605_vm4 = vcmask 64512   ;;  %vm231_vm5 = vcmask 1040384   ;;  %v1155_v48 = vld [vmem:[#allocation18 + $0x28] sm:$0xff] }
  0xfc   :  { %v471_v22 = vsub.s32 %v468_v20, %v3898_v21  ;;  %3155 = vset.pattern.permute.xlu1 %v3557_v56  ;;  %v760_v20 = vld [vmem:[#allocation15] sm:$0xff]  ;;  %v761_v21 = vld [vmem:[#allocation15 + $0x8] sm:$0xff]  ;;  %v1156_v56 = vld [vmem:[#allocation18 + $0x30] sm:$0xff]  ;;  %vm1732_vm6 = vcmask 254976  }
  0xfd   :  { %2992 = vmatpush3.bf16.msra.mxu0 %v2991_v12 }
  0xfe   :  { %2999 = vmatprep.subr.bf16.mxu0 %v3553_v3  ;;  %2998 = vmatpush3.bf16.msra.mxu1 %v2997_v13  ;;  %s226_s7 = scalar_lea.vmem [#allocation10], %s2545_s6 }
  0xff   :  { %2746 = vmatprep.subr.mxu1 %v3555_v9  ;;  %s223_s10 = scalar_lea.vmem [#allocation10], %s222_s24 }
 0x100   :  { %2722 = vmatmul.mubr.msk.f32.vlgmr.msra.gmra.mrb[0].mxu0 %vm241_vm1, %v236_v14 }
 0x101   :  { %3001 = vmatpush3.bf16.msra.mxu0 %v2994_v8  ;;  %2733 = vmatmul.mubr.msk.f32.vlgmr.msra.gmra.mrb[0].mxu1 %vm241_vm1, %v233_v15 }
 0x102   :  { %3002 = vmatprep.subr.bf16.mxu0 %v3553_v3  ;;  %2743 = vmatprep.mubr.msk.f32.mxu0 %vm3554_vm0, %v3555_v9 }
 0x103   :  { %2747 = vmatpush3.msra.mxu1 %v233_v15  ;;  %2748 = vmatprep.mubr.msk.f32.mxu1 %vm3554_vm0, %v3555_v9 }
 0x104   :  { %2751 = vmatprep.subr.mxu1 %v3555_v9 }
 0x105   :  { %3004 = vmatpush3.bf16.msra.mxu0 %v2997_v13 }
 0x106   :  { %3005 = vmatprep.subr.bf16.mxu0 %v3553_v3 }
 0x108   :  { %2744 = vmatmul.mubr.msk.f32.vlgmr.msra.gmra.mrb[2].mxu0 %vm241_vm1, %v3891_v16 }
 0x109   :  { %2764 = vmatprep.mubr.msk.f32.mxu0 %vm3554_vm0, %v3555_v9 }
 0x1d3   :  { %v311_v23 = vpop.f32.mrb[0].mxu0 }
 0x1d4   :  { %v472_v24 = vrot.slane %v311_v23, %v471_v22  ;;  %v2723_v25 = vpop.f32.mrb[1].mxu0  ;;  %v388_v26 = vpop.f32.mrb[0].mxu1  ;;  %v3012_v23 = vpack.c.bf16 %v761_v21, %v760_v20  ;;  %v1247_v20 = vld [vmem:[#allocation16 + $0x58] sm:$0xff]  ;;  %v1481_v21 = vld [vmem:[#allocation16 + $0x70] sm:$0xff] }
 0x1d5   :  { %v2734_v28 = vpop.f32.mrb[1].mxu1  ;;  %v762_v25 = vld [vmem:[#allocation15 + $0x10] sm:$0xff] }
 0x1d6   :  { %v473_v29 = vcombine.high %v472_v24, %v472_v24  ;;  %v480_v30 = vrot.slane %v472_v24, %v471_v22  ;;  %v764_v28 = vld [vmem:[#allocation16] sm:$0xff] }
 0x1d8   :  { %v491_v31 = vrot.slane %v480_v30, %v3902_v27  ;;  %v487_v32 = vrot.slane %v473_v29, %v471_v22  ;;  %v765_v29 = vld [vmem:[#allocation16 + $0x8] sm:$0xff] }
 0x1da   :  { %v498_v34 = vadd.f32 %v491_v31, %v388_v26  ;;  %v495_v35 = vrot.slane %v487_v32, %v3902_v27  ;;  %v763_v26 = vld [vmem:[#allocation15 + $0x18] sm:$0xff]  ;;  %v1009_v31 = vld [vmem:[#allocation16 + $0x20] sm:$0xff]  ;;  %v3006_v32 = vpack.c.bf16 %v765_v29, %v764_v28  ;;  %v1391_v29 = vld [vmem:[#allocation18 + $0x50] sm:$0xff] }
 0x1db   :  { %v461_v36 = vpop.f32.mrb[2].mxu0 }
 0x1dc   :  { %v507_v37 = vadd.f32 %v2549_v33, %v498_v34  ;;  %v499_v38 = vadd.f32 %v495_v35, %v461_v36  ;;  %v2745_v39 = vpop.f32.mrb[3].mxu0  ;;  %v1010_v34 = vld [vmem:[#allocation16 + $0x28] sm:$0xff]  ;;  %3007 = vmatpush3.bf16.msra.mxu0 %v3006_v32  ;;  %v1626_v32 = vld [vmem:[#allocation18 + $0x70] sm:$0xff] }
 0x1dd   :  { %v3024_v36 = vpack.c.bf16 %v1010_v34, %v1009_v31  ;;  %3008 = vmatprep.subr.bf16.mxu0 %v3553_v3  ;;  %v1011_v39 = vld [vmem:[#allocation16 + $0x30] sm:$0xff] }
 0x1de   :  { %3157 = vtanh.f32 %v507_v37  ;;  %v508_v40 = vadd.f32 %v2549_v33, %v499_v38  ;;  %v224_v33 = vld [vmem:[%s223_s10] sm:$0x1]  ;;  %v767_v38 = vld [vmem:[#allocation16 + $0x18] sm:$0xff] }
 0x1df   :  { %v766_v37 = vld [vmem:[#allocation16 + $0x10] sm:$0xff] }
 0x1e0   :  { %3159 = vtanh.f32 %v508_v40  ;;  %v3009_v40 = vpack.c.bf16 %v767_v38, %v766_v37  ;;  %v1475_v37 = vld [vmem:[#allocation15 + $0x68] sm:$0xff] }
 0x1e2   :  { %3010 = vmatpush3.bf16.msra.mxu0 %v3009_v40  ;;  %v1476_v40 = vld [vmem:[#allocation15 + $0x70] sm:$0xff] }
 0x1e3   :  { %3017 = vmatprep.subr.bf16.mxu0 %v3553_v3 }
 0x1e8   :  { %v3158_v42 = vpop.eup %3157 }
 0x1e9   :  { %v518_v43 = vmul.f32 %v3158_v42, %v2550_v41 }
 0x1ea   :  { %v3160_v44 = vpop.eup %3159 }
 0x1eb   :  { %v520_v45 = vsel %vm241_vm1, %v518_v43, 0.0  ;;  %v519_v46 = vmul.f32 %v3160_v44, %v2550_v41  ;;  %v1012_v41 = vld [vmem:[#allocation16 + $0x38] sm:$0xff] }
 0x1ec   :  { %521 = vadd.xlane.f32.xlu0 %v520_v45  ;;  %v3027_v42 = vpack.c.bf16 %v1012_v41, %v1011_v39  ;;  %v917_v45 = vld [vmem:[#allocation18] sm:$0xff]  ;;  %v1477_v41 = vld [vmem:[#allocation15 + $0x78] sm:$0xff] }
 0x1ed   :  { %v523_v47 = vsel %vm241_vm1, %v519_v46, 0.0  ;;  %v918_v46 = vld [vmem:[#allocation18 + $0x8] sm:$0xff] }
 0x1f0   :  { %524 = vadd.xlane.f32.xlu0 %v523_v47  ;;  %v1154_v47 = vld [vmem:[#allocation18 + $0x20] sm:$0xff] }
 0x279   :  { %v522_v49 = vpop.xlane.xlu0 %521 }
 0x27a   :  { %v533_v52 = vrot.slane %v522_v49, %v532_v50 }
 0x27d   :  { %v525_v51 = vpop.xlane.xlu0 %524 }
 0x27e   :  { %v537_v53 = vrot.slane %v525_v51, %v532_v50 }
 0x280   :  { %v539_v54 = vsel %vm538_vm2, %v537_v53, %v533_v52  ;;  %v3018_v52 = vpack.c.bf16 %v918_v46, %v917_v45  ;;  %v3036_v53 = vpack.c.bf16 %v1155_v48, %v1154_v47  ;;  %v1742_v45 = vld [vmem:[#allocation21] sm:$0xff]  ;;  %v1743_v46 = vld [vmem:[#allocation21 + $0x8] sm:$0xff] }
 0x281   :  { %v542_v55 = vsel %vm541_vm3, %v539_v54, -inf  ;;  %v919_v54 = vld [vmem:[#allocation18 + $0x10] sm:$0xff]  ;;  %v1738_v47 = vld [vmem:[#allocation19] sm:$0xff]  ;;  %v3078_v48 = vpack.c.bf16 %v1743_v46, %v1742_v45 }
 0x282   :  { %543 = vmax.xlane.f32.xlu1 %v542_v55  ;;  %v920_v55 = vld [vmem:[#allocation18 + $0x18] sm:$0xff]  ;;  %v2566_v46 = vld [vmem:[%s4140_s12 + $0x2] ss:$0 sm:$0xff] }
 0x30f   :  { %v544_v58 = vpop.xlane.xlu1 %543 }
 0x310   :  { %v549_v59 = vrot.slane %v544_v58, %v3902_v27  ;;  %v553_v60 = vrot.slane %v544_v58, %v552_v57 }
 0x312   :  { %v556_v61 = vsub.f32 %v522_v49, %v549_v59  ;;  %v557_v62 = vsub.f32 %v525_v51, %v553_v60  ;;  %v3021_v59 = vpack.c.bf16 %v920_v55, %v919_v54  ;;  %v1741_v54 = vld [vmem:[#allocation19 + $0x18] sm:$0xff] }
 0x314   :  { %v558_v63 = vmul.f32 1.442695, %v556_v61  ;;  %v560_v0 = vmul.f32 1.442695, %v557_v62  ;;  %v1004_v61 = vld [vmem:[#allocation15 + $0x20] sm:$0xff]  ;;  %v1005_v62 = vld [vmem:[#allocation15 + $0x28] sm:$0xff] }
 0x316   :  { %3161 = vpow2.f32 %v558_v63  ;;  %v1239_v63 = vld [vmem:[#allocation15 + $0x40] sm:$0xff] }
 0x317   :  { %3163 = vpow2.f32 %v560_v0  ;;  %v1240_v0 = vld [vmem:[#allocation15 + $0x48] sm:$0xff] }
 0x320   :  { %v3162_v1 = vpop.eup %3161 }
 0x321   :  { %v3164_v2 = vpop.eup %3163  ;;  %565 = vperm.xlu1 %3155, %v3162_v1  }
 0x322   :  { %568 = vperm.xlu0 %3156, %v3164_v2  }
 0x3a0   :  { %v566_v4 = vpop.permute.xlu1 %565 }
 0x3a1   :  { %v569_v5 = vpop.permute.xlu0 %568  ;;  %v573_v6 = vrot.slane %v566_v4, %v532_v50  ;;  %v3048_v4 = vpack.c.bf16 %v1240_v0, %v1239_v63  ;;  %v2065_v63 = vld [vmem:[#allocation21 + $0x40] sm:$0xff]  ;;  %v2066_v0 = vld [vmem:[#allocation21 + $0x48] sm:$0xff] }
 0x3a2   :  { %v577_v7 = vrot.slane %v569_v5, %v532_v50  ;;  %v1006_v5 = vld [vmem:[#allocation15 + $0x30] sm:$0xff] }
 0x3a4   :  { %v578_v8 = vsel %vm538_vm2, %v577_v7, %v573_v6  ;;  %v1007_v6 = vld [vmem:[#allocation15 + $0x38] sm:$0xff]  ;;  %v1241_v7 = vld [vmem:[#allocation15 + $0x50] sm:$0xff] }
 0x3a5   :  { %v580_v10 = vsel %vm541_vm3, %v578_v8, 0.0  ;;  %v1242_v8 = vld [vmem:[#allocation15 + $0x58] sm:$0xff] }
 0x3a6   :  { %581 = vadd.xlane.f32.xlu1 %v580_v10  ;;  %v3033_v10 = vpack.c.bf16 %v1007_v6, %v1006_v5  ;;  %v2224_v6 = vld [vmem:[#allocation21 + $0x60] sm:$0xff] }
 0x433   :  { %v582_v11 = vpop.xlane.xlu1 %581 }
 0x434   :  { %3165 = vrcp.f32 %v582_v11  ;;  %v3051_v11 = vpack.c.bf16 %v1242_v8, %v1241_v7  ;;  %v2225_v7 = vld [vmem:[#allocation21 + $0x68] sm:$0xff] }
 0x435   :  { %v3114_v8 = vpack.c.bf16 %v2225_v7, %v2224_v6  ;;  %v1901_v7 = vld [vmem:[#allocation19 + $0x20] sm:$0xff] }
 0x43e   :  { %v3166_v12 = vpop.eup %3165 }
 0x43f   :  { %v588_v13 = vrot.slane %v3166_v12, %v3902_v27  ;;  %v592_v15 = vrot.slane %v3166_v12, %v552_v57  ;;  %v3015_v27 = vpack.c.bf16 %v763_v26, %v762_v25  ;;  %v1157_v57 = vld [vmem:[#allocation18 + $0x38] sm:$0xff]  ;;  %v1244_v12 = vld [vmem:[#allocation16 + $0x40] sm:$0xff]  ;;  %v1390_v26 = vld [vmem:[#allocation18 + $0x48] sm:$0xff] }
 0x440   :  { %v3039_v60 = vpack.c.bf16 %v1157_v57, %v1156_v56  ;;  %v1389_v25 = vld [vmem:[#allocation18 + $0x40] sm:$0xff]  ;;  %v1907_v57 = vld [vmem:[#allocation21 + $0x28] sm:$0xff] }
 0x441   :  { %v595_v14 = vmul.f32 %v3162_v1, %v588_v13  ;;  %v596_v17 = vmul.f32 %v3164_v2, %v592_v15  ;;  %v3947_v1 = vld [vmem:[#allocation6] sm:$0x3]  ;;  %v3030_v2 = vpack.c.bf16 %v1005_v62, %v1004_v61  ;;  %v1245_v13 = vld [vmem:[#allocation16 + $0x48] sm:$0xff]  ;;  %v3054_v28 = vpack.c.bf16 %v1390_v26, %v1389_v25  ;;  %v1906_v56 = vld [vmem:[#allocation21 + $0x20] sm:$0xff] }
 0x442   :  { %v1480_v15 = vld [vmem:[#allocation16 + $0x68] sm:$0xff]  ;;  %v1909_v61 = vld [vmem:[#allocation21 + $0x38] sm:$0xff] }
 0x443   :  { %599 = vperm.xlu0 %3156, %v595_v14   ;;  %v1479_v14 = vld [vmem:[#allocation16 + $0x60] sm:$0xff] }
 0x447   :  { %680 = vperm.xlu0 %3156, %v596_v17   ;;  %v3042_v17 = vpack.c.bf16 %v1245_v13, %v1244_v12 }
 0x4c2   :  { %v600_v18 = vpop.permute.xlu0 %599 }
 0x4c3   :  { %v604_v19 = vrot.slane %v600_v18, %v532_v50  ;;  %v3060_v18 = vpack.c.bf16 %v1480_v15, %v1479_v14 }
 0x4c5   :  { %2749 = vmatmul.mubr.msk.f32.vlgmr.msra.gmra.mrb[2].mxu1 %vm605_vm4, %v604_v19  ;;  %v1246_v19 = vld [vmem:[#allocation16 + $0x50] sm:$0xff] }
 0x4c6   :  { %2752 = vmatpush3.msra.mxu1 %v3891_v16  ;;  %v681_v22 = vpop.permute.xlu0 %680  ;;  %2753 = vmatprep.mubr.msk.f32.mxu1 %vm3554_vm0, %v3555_v9  ;;  %v227_v16 = vld [vmem:[%s226_s7] sm:$0x1] }
 0x4c7   :  { %v685_v24 = vrot.slane %v681_v22, %v532_v50  ;;  %3011 = vmatprep.subr.bf16.mxu1 %v3553_v3  ;;  %v229_v30 = vrot.slane %v227_v16, 7  ;;  %v1482_v22 = vld [vmem:[#allocation16 + $0x78] sm:$0xff]  ;;  %v1625_v16 = vld [vmem:[#allocation18 + $0x68] sm:$0xff] }
 0x4c9   :  { %2754 = vmatmul.mubr.msk.f32.vlgmr.msra.gmra.mrb[4].mxu1 %vm605_vm4, %v685_v24  ;;  %v3924_v35 = vsel %vm231_vm5, %v224_v33, %v229_v30  ;;  %v3063_v24 = vpack.c.bf16 %v1482_v22, %v1481_v21  ;;  %v1392_v30 = vld [vmem:[#allocation18 + $0x58] sm:$0xff] }
 0x4ca   :  { %3013 = vmatpush3.bf16.msra.mxu1 %v3012_v23  ;;  %2775 = vmatprep.mubr.msk.f32.mxu1 %vm3554_vm0, %v3555_v9  ;;  %v3045_v23 = vpack.c.bf16 %v1247_v20, %v1246_v19  ;;  %v1627_v33 = vld [vmem:[#allocation18 + $0x78] sm:$0xff]  ;;  %v3057_v34 = vpack.c.bf16 %v1392_v30, %v1391_v29  ;;  %v2556_v20 = vld [vmem:[%s4140_s12] ss:$0 sm:$0xff] }
 0x4cb   :  { %3014 = vmatprep.subr.bf16.mxu1 %v3553_v3  ;;  %v3075_v38 = vpack.c.bf16 %v1627_v33, %v1626_v32  ;;  %v2561_v32 = vld [vmem:[%s4140_s12 + $0x1] ss:$0 sm:$0xff] }
 0x4ce   :  { %3016 = vmatpush3.bf16.msra.mxu1 %v3015_v27  ;;  %v1624_v27 = vld [vmem:[#allocation18 + $0x60] sm:$0xff] }
 0x4cf   :  { %3023 = vmatprep.subr.bf16.mxu1 %v3553_v3  ;;  %v3072_v31 = vpack.c.bf16 %v1625_v16, %v1624_v27 }
 0x4d1   :  { %2776 = vmatmul.mubr.msk.f32.vlgmr.msra.gmra.mrb[6].mxu1 %vm241_vm1, %v3924_v35 }
 0x4d2   :  { %3025 = vmatpush3.bf16.msra.mxu1 %v3024_v36  ;;  %2797 = vmatprep.mubr.msk.f32.mxu1 %vm3554_vm0, %v3555_v9  ;;  %v1474_v36 = vld [vmem:[#allocation15 + $0x60] sm:$0xff] }
 0x4d3   :  { %3026 = vmatprep.subr.bf16.mxu1 %v3553_v3  ;;  %v3066_v39 = vpack.c.bf16 %v1475_v37, %v1474_v36 }
 0x4d6   :  { %3028 = vmatpush3.bf16.msra.mxu1 %v3027_v42  ;;  %v3069_v42 = vpack.c.bf16 %v1477_v41, %v1476_v40 }
 0x4d7   :  { %3035 = vmatprep.subr.bf16.mxu1 %v3553_v3 }
 0x598   :  { %v674_v43 = vpop.f32.mrb[2].mxu1 }
 0x599   :  { %v2750_v44 = vpop.f32.mrb[3].mxu1 }
 0x59c   :  { %v754_v49 = vpop.f32.mrb[4].mxu1 }
 0x59d   :  { %v770_v50 = vrot.slane %v754_v49, 7  ;;  %v2755_v51 = vpop.f32.mrb[5].mxu1  ;;  %v1739_v49 = vld [vmem:[#allocation19 + $0x8] sm:$0xff] }
 0x59e   :  { %v1745_v51 = vld [vmem:[#allocation21 + $0x18] sm:$0xff] }
 0x59f   :  { %v3935_v58 = vsel %vm538_vm2, %v770_v50, %v674_v43  ;;  %v1744_v50 = vld [vmem:[#allocation21 + $0x10] sm:$0xff] }
 0x5a0   :  { %2765 = vmatmul.mubr.msk.f32.vlgmr.msra.gmra.mrb[4].mxu0 %vm241_vm1, %v3935_v58  ;;  %2798 = vmatmul.mubr.msk.f32.vlgmr.msra.gmra.mrb[8].mxu1 %vm241_vm1, %v3935_v58  ;;  %v3081_v55 = vpack.c.bf16 %v1745_v51, %v1744_v50 }
 0x5a1   :  { %3019 = vmatpush3.bf16.msra.mxu0 %v3018_v52  ;;  %3037 = vmatpush3.bf16.msra.mxu1 %v3036_v53  ;;  %v3084_v52 = vpack.c.bf16 %v1739_v49, %v1738_v47  ;;  %v1740_v53 = vld [vmem:[#allocation19 + $0x10] sm:$0xff] }
 0x5a2   :  { %3020 = vmatprep.subr.bf16.mxu0 %v3553_v3  ;;  %3038 = vmatprep.subr.bf16.mxu1 %v3553_v3 }
 0x5a3   :  { %2786 = vmatprep.mubr.msk.f32.mxu0 %vm3554_vm0, %v3555_v9  ;;  %2819 = vmatprep.mubr.msk.f32.mxu1 %vm3554_vm0, %v3555_v9 }
 0x5a4   :  { %v4001_v43 = vpop.f32.mrb[6].mxu1 }
 0x5a5   :  { %3022 = vmatpush3.bf16.msra.mxu0 %v3021_v59  ;;  %3040 = vmatpush3.bf16.msra.mxu1 %v3039_v60  ;;  %v2777_v44 = vpop.f32.mrb[7].mxu1  ;;  %v3090_v59 = vpack.c.bf16 %v1907_v57, %v1906_v56  ;;  %v1908_v60 = vld [vmem:[#allocation21 + $0x30] sm:$0xff] }
 0x5a6   :  { %3029 = vmatprep.subr.bf16.mxu0 %v3553_v3  ;;  %3047 = vmatprep.subr.bf16.mxu1 %v3553_v3  ;;  %v3093_v62 = vpack.c.bf16 %v1909_v61, %v1908_v60  ;;  %v2571_v56 = vld [vmem:[%s4140_s12 + $0x3] ss:$0 sm:$0xff] }
 0x5a8   :  { %2787 = vmatmul.mubr.msk.f32.vlgmr.msra.gmra.mrb[6].mxu0 %vm241_vm1, %v3947_v1  ;;  %2820 = vmatmul.mubr.msk.f32.vlgmr.msra.gmra.mrb[10].mxu1 %vm241_vm1, %v3947_v1 }
 0x5a9   :  { %3031 = vmatpush3.bf16.msra.mxu0 %v3030_v2  ;;  %3049 = vmatpush3.bf16.msra.mxu1 %v3048_v4  ;;  %v2067_v2 = vld [vmem:[#allocation21 + $0x50] sm:$0xff]  ;;  %v2068_v4 = vld [vmem:[#allocation21 + $0x58] sm:$0xff] }
 0x5aa   :  { %3032 = vmatprep.subr.bf16.mxu0 %v3553_v3  ;;  %3050 = vmatprep.subr.bf16.mxu1 %v3553_v3  ;;  %v3105_v5 = vpack.c.bf16 %v2068_v4, %v2067_v2 }
 0x5ab   :  { %2808 = vmatprep.mubr.msk.f32.mxu0 %vm3554_vm0, %v3555_v9  ;;  %2841 = vmatprep.mubr.msk.f32.mxu1 %vm3554_vm0, %v3555_v9 }
 0x5ad   :  { %3034 = vmatpush3.bf16.msra.mxu0 %v3033_v10  ;;  %3052 = vmatpush3.bf16.msra.mxu1 %v3051_v11  ;;  %v2226_v10 = vld [vmem:[#allocation21 + $0x70] sm:$0xff]  ;;  %v2227_v11 = vld [vmem:[#allocation21 + $0x78] sm:$0xff] }
 0x5ae   :  { %3041 = vmatprep.subr.bf16.mxu0 %v3553_v3  ;;  %3059 = vmatprep.subr.bf16.mxu1 %v3553_v3  ;;  %v3117_v12 = vpack.c.bf16 %v2227_v11, %v2226_v10 }
 0x5b0   :  { %2809 = vmatmul.mubr.msk.f32.vlgmr.msra.gmra.mrb[8].mxu0 %vm241_vm1, %v3924_v35  ;;  %2842 = vmatmul.mubr.msk.f32.vlgmr.msra.gmra.mrb[12].mxu1 %vm241_vm1, %v3924_v35 }
 0x5b1   :  { %3043 = vmatpush3.bf16.msra.mxu0 %v3042_v17  ;;  %3061 = vmatpush3.bf16.msra.mxu1 %v3060_v18 }
 0x5b2   :  { %3044 = vmatprep.subr.bf16.mxu0 %v3553_v3  ;;  %3062 = vmatprep.subr.bf16.mxu1 %v3553_v3 }
 0x5b3   :  { %2830 = vmatprep.mubr.msk.f32.mxu0 %vm3554_vm0, %v3555_v9  ;;  %2863 = vmatprep.mubr.msk.f32.mxu1 %vm3554_vm0, %v3555_v9 }
 0x5b5   :  { %3046 = vmatpush3.bf16.msra.mxu0 %v3045_v23  ;;  %3064 = vmatpush3.bf16.msra.mxu1 %v3063_v24 }
 0x5b6   :  { %3053 = vmatprep.subr.bf16.mxu0 %v3553_v3  ;;  %3071 = vmatprep.subr.bf16.mxu1 %v3553_v3 }
 0x5b8   :  { %2831 = vmatmul.mubr.msk.f32.vlgmr.msra.gmra.mrb[10].mxu0 %vm241_vm1, %v3935_v58  ;;  %2864 = vmatmul.mubr.msk.f32.vlgmr.msra.gmra.mrb[14].mxu1 %vm241_vm1, %v3935_v58  ;;  %v1735_v58 = vld [vmem:[#allocation6 + $0x2] sm:$0x3] }
 0x5b9   :  { %3055 = vmatpush3.bf16.msra.mxu0 %v3054_v28  ;;  %2852 = vmatprep.mubr.msk.f32.mxu0 %vm3554_vm0, %v3555_v9 }
 0x5ba   :  { %3056 = vmatprep.subr.bf16.mxu0 %v3553_v3  ;;  %3073 = vmatpush3.bf16.msra.mxu1 %v3072_v31 }
 0x5bb   :  { %3074 = vmatprep.subr.bf16.mxu1 %v3553_v3  ;;  %2885 = vmatprep.mubr.msk.f32.mxu1 %vm3554_vm0, %v3555_v9 }
 0x5bd   :  { %3058 = vmatpush3.bf16.msra.mxu0 %v3057_v34 }
 0x5be   :  { %3065 = vmatprep.subr.bf16.mxu0 %v3553_v3  ;;  %3076 = vmatpush3.bf16.msra.mxu1 %v3075_v38 }
 0x5bf   :  { %3083 = vmatprep.subr.bf16.mxu1 %v3553_v3 }
 0x5c0   :  { %2853 = vmatmul.mubr.msk.f32.vlgmr.msra.gmra.mrb[12].mxu0 %vm241_vm1, %v3947_v1 }
 0x5c1   :  { %3067 = vmatpush3.bf16.msra.mxu0 %v3066_v39  ;;  %2874 = vmatprep.mubr.msk.f32.mxu0 %vm3554_vm0, %v3555_v9 }
 0x5c2   :  { %3068 = vmatprep.subr.bf16.mxu0 %v3553_v3  ;;  %2886 = vmatmul.mubr.msk.f32.vlgmr.msra.gmra.mrb[16].mxu1 %vm241_vm1, %v3947_v1  ;;  %v3102_v1 = vpack.c.bf16 %v2066_v0, %v2065_v63 }
 0x5c3   :  { %2907 = vmatprep.mubr.msk.f32.mxu1 %vm3554_vm0, %v3555_v9  ;;  %3085 = vmatpush3.bf16.msra.mxu1 %v3084_v52 }
 0x5c4   :  { %3086 = vmatprep.subr.bf16.mxu1 %v3553_v3 }
 0x5c5   :  { %3070 = vmatpush3.bf16.msra.mxu0 %v3069_v42 }
 0x5c6   :  { %3077 = vmatprep.subr.bf16.mxu0 %v3553_v3 }
 0x5c8   :  { %2875 = vmatmul.mubr.msk.f32.vlgmr.msra.gmra.mrb[14].mxu0 %vm241_vm1, %v3924_v35  ;;  %v3087_v35 = vpack.c.bf16 %v1741_v54, %v1740_v53 }
 0x5c9   :  { %2896 = vmatprep.mubr.msk.f32.mxu0 %vm3554_vm0, %v3555_v9  ;;  %3079 = vmatpush3.bf16.msra.mxu0 %v3078_v48 }
 0x5ca   :  { %3080 = vmatprep.subr.bf16.mxu0 %v3553_v3  ;;  %3088 = vmatpush3.bf16.msra.mxu1 %v3087_v35 }
 0x5cb   :  { %3095 = vmatprep.subr.bf16.mxu1 %v3553_v3 }
 0x5cd   :  { %3082 = vmatpush3.bf16.msra.mxu0 %v3081_v55 }
 0x5ce   :  { %3089 = vmatprep.subr.bf16.mxu0 %v3553_v3 }
 0x5d0   :  { %2897 = vmatmul.mubr.msk.f32.vlgmr.msra.gmra.mrb[16].mxu0 %vm241_vm1, %v1735_v58 }
 0x5d1   :  { %3091 = vmatpush3.bf16.msra.mxu0 %v3090_v59  ;;  %2918 = vmatprep.mubr.msk.f32.mxu0 %vm3554_vm0, %v3555_v9 }
 0x5d2   :  { %3092 = vmatprep.subr.bf16.mxu0 %v3553_v3 }
 0x5d5   :  { %3094 = vmatpush3.bf16.msra.mxu0 %v3093_v62  ;;  %v759_v62 = vld [vmem:[#allocation7] sm:$0x3] }
 0x5d6   :  { %3101 = vmatprep.subr.bf16.mxu0 %v3553_v3 }
 0x5d8   :  { %2919 = vmatmul.mubr.msk.f32.vlgmr.msra.gmra.mrb[18].mxu0 %vm241_vm1, %v1735_v58 }
 0x5d9   :  { %3103 = vmatpush3.bf16.msra.mxu0 %v3102_v1  ;;  %2940 = vmatprep.mubr.msk.f32.mxu0 %vm3554_vm0, %v3555_v9 }
 0x5da   :  { %3104 = vmatprep.subr.bf16.mxu0 %v3553_v3 }
 0x5dd   :  { %3106 = vmatpush3.bf16.msra.mxu0 %v3105_v5 }
 0x5de   :  { %3113 = vmatprep.subr.bf16.mxu0 %v3553_v3 }
 0x5e0   :  { %2941 = vmatmul.mubr.msk.f32.vlgmr.msra.gmra.mrb[20].mxu0 %vm241_vm1, %v1735_v58 }
 0x5e1   :  { %3115 = vmatpush3.bf16.msra.mxu0 %v3114_v8  ;;  %2962 = vmatprep.mubr.msk.f32.mxu0 %vm3554_vm0, %v3555_v9  ;;  %v1902_v8 = vld [vmem:[#allocation19 + $0x28] sm:$0xff] }
 0x5e2   :  { %3116 = vmatprep.subr.bf16.mxu0 %v3553_v3 }
 0x5e5   :  { %3118 = vmatpush3.bf16.msra.mxu0 %v3117_v12  ;;  %v3096_v12 = vpack.c.bf16 %v1902_v8, %v1901_v7 }
 0x5e6   :  { %3125 = vmatprep.subr.bf16.mxu0 %v3553_v3 }
 0x5e8   :  { %2963 = vmatmul.mubr.msk.f32.vlgmr.msra.gmra.mrb[22].mxu0 %vm241_vm1, %v1735_v58 }
 0x5e9   :  { %2984 = vmatprep.mubr.msk.f32.mxu0 %vm3554_vm0, %v3555_v9 }
 0x673   :  { %v840_v13 = vpop.f32.mrb[4].mxu0  ;;  %v1079_v14 = vpop.f32.mrb[8].mxu1 }
 0x674   :  { %v914_v15 = vadd.f32 %v4001_v43, %v840_v13  ;;  %v2766_v17 = vpop.f32.mrb[5].mxu0  ;;  %v2799_v18 = vpop.f32.mrb[9].mxu1 }
 0x675   :  { %v2060_v18 = vld [vmem:[#allocation19 + $0x40] sm:$0xff] }
 0x67b   :  { %v990_v19 = vpop.f32.mrb[6].mxu0  ;;  %v1224_v21 = vpop.f32.mrb[10].mxu1 }
 0x67c   :  { %v994_v22 = vadd.f32 %v990_v19, %v914_v15  ;;  %v2788_v23 = vpop.f32.mrb[7].mxu0  ;;  %v2821_v24 = vpop.f32.mrb[11].mxu1  ;;  %v1904_v15 = vld [vmem:[#allocation19 + $0x38] sm:$0xff]  ;;  %v2061_v19 = vld [vmem:[#allocation19 + $0x48] sm:$0xff] }
 0x67d   :  { %v2219_v24 = vld [vmem:[#allocation19 + $0x60] sm:$0xff] }
 0x67e   :  { %v1002_v25 = vadd.f32 %v2556_v20, %v994_v22  ;;  %v3108_v20 = vpack.c.bf16 %v2061_v19, %v2060_v18  ;;  %v2063_v22 = vld [vmem:[#allocation19 + $0x58] sm:$0xff] }
 0x680   :  { %v1708_v26 = vsub.f32 0.0, %v1002_v25  ;;  %v2220_v25 = vld [vmem:[#allocation19 + $0x68] sm:$0xff] }
 0x682   :  { %v1709_v27 = vmul.f32 1.442695, %v1708_v26  ;;  %v3120_v26 = vpack.c.bf16 %v2220_v25, %v2219_v24 }
 0x683   :  { %v1149_v16 = vpop.f32.mrb[8].mxu0  ;;  %v1384_v28 = vpop.f32.mrb[12].mxu1 }
 0x684   :  { %v1150_v29 = vadd.f32 %v1149_v16, %v1079_v14  ;;  %v2810_v30 = vpop.f32.mrb[9].mxu0  ;;  %v2843_v31 = vpop.f32.mrb[13].mxu1  ;;  %3167 = vpow2.f32 %v1709_v27  ;;  %v1903_v14 = vld [vmem:[#allocation19 + $0x30] sm:$0xff]  ;;  %v2222_v16 = vld [vmem:[#allocation19 + $0x78] sm:$0xff] }
 0x685   :  { %v3099_v17 = vpack.c.bf16 %v1904_v15, %v1903_v14  ;;  %v2221_v27 = vld [vmem:[#allocation19 + $0x70] sm:$0xff] }
 0x686   :  { %v1228_v33 = vadd.f32 %v1224_v21, %v1150_v29  ;;  %v2062_v21 = vld [vmem:[#allocation19 + $0x50] sm:$0xff] }
 0x687   :  { %v3111_v23 = vpack.c.bf16 %v2063_v22, %v2062_v21 }
 0x688   :  { %v1237_v34 = vadd.f32 %v2561_v32, %v1228_v33 }
 0x68a   :  { %v1714_v36 = vsub.f32 0.0, %v1237_v34 }
 0x68b   :  { %v1314_v37 = vpop.f32.mrb[10].mxu0  ;;  %v1549_v38 = vpop.f32.mrb[14].mxu1 }
 0x68c   :  { %v1715_v39 = vmul.f32 1.442695, %v1714_v36  ;;  %v1385_v40 = vadd.f32 %v1384_v28, %v1314_v37  ;;  %v2832_v41 = vpop.f32.mrb[11].mxu0  ;;  %v2865_v42 = vpop.f32.mrb[15].mxu1  ;;  %v3123_v28 = vpack.c.bf16 %v2222_v16, %v2221_v27 }
 0x68d   :  { %v2408_v41 = vld [vmem:[%s4144_s16 + $0x18] sm:$0xff] }
 0x68e   :  { %3169 = vpow2.f32 %v1715_v39  ;;  %v3168_v43 = vpop.eup %3167  ;;  %v2407_v39 = vld [vmem:[%s4144_s16 + $0x10] sm:$0xff] }
 0x68f   :  { %v1711_v44 = vadd.f32 1.0, %v3168_v43  ;;  %v3129_v42 = vpack.c.bf16 %v2408_v41, %v2407_v39 }
 0x691   :  { %3171 = vrcp.f32 %v1711_v44  ;;  %v2574_v44 = vld [vmem:[%s4143_s15] ss:$0 sm:$0xff] }
 0x693   :  { %v1459_v45 = vpop.f32.mrb[12].mxu0 }
 0x694   :  { %v1463_v47 = vadd.f32 %v1459_v45, %v1385_v40  ;;  %v2854_v48 = vpop.f32.mrb[13].mxu0 }
 0x695   :  { %v1694_v49 = vpop.f32.mrb[16].mxu1 }
 0x696   :  { %v1472_v50 = vadd.f32 %v2566_v46, %v1463_v47  ;;  %v2887_v51 = vpop.f32.mrb[17].mxu1 }
 0x697   :  { %v2578_v51 = vld [vmem:[%s4143_s15 + $0x1] ss:$0 sm:$0xff] }
 0x698   :  { %v3170_v52 = vpop.eup %3169  ;;  %3173 = vtanh.f32 %v1472_v50 }
 0x699   :  { %v1717_v53 = vadd.f32 1.0, %v3170_v52 }
 0x69b   :  { %3175 = vrcp.f32 %v1717_v53  ;;  %v1619_v54 = vpop.f32.mrb[14].mxu0  ;;  %v3172_v59 = vpop.eup %3171 }
 0x69c   :  { %v1620_v55 = vadd.f32 %v1619_v54, %v1549_v38  ;;  %v2876_v35 = vpop.f32.mrb[15].mxu0  ;;  %v2405_v38 = vld [vmem:[%s4144_s16] sm:$0xff] }
 0x69e   :  { %v1698_v57 = vadd.f32 %v1694_v49, %v1620_v55 }
 0x6a0   :  { %v1707_v58 = vadd.f32 %v2571_v56, %v1698_v57  ;;  %v2582_v56 = vld [vmem:[%s4143_s15 + $0x2] ss:$0 sm:$0xff] }
 0x6a2   :  { %v3174_v60 = vpop.eup %3173  ;;  %v1721_v61 = vsub.f32 0.0, %v1707_v58 }
 0x6a3   :  { %v1728_v63 = vmul.f32 %v3174_v60, %v3172_v59  ;;  %v1815_v29 = vpop.f32.mrb[16].mxu0 }
 0x6a4   :  { %v1722_v0 = vmul.f32 1.442695, %v1721_v61  ;;  %v2898_v30 = vpop.f32.mrb[17].mxu0 }
 0x6a5   :  { %v3176_v1 = vpop.eup %3175 }
 0x6a6   :  { %v1727_v2 = vmul.f32 %v3176_v1, %v759_v62  ;;  %3177 = vpow2.f32 %v1722_v0 }
 0x6a8   :  { %v1729_v4 = vadd.f32 %v1728_v63, %v1727_v2  ;;  %v2586_v63 = vld [vmem:[%s4143_s15 + $0x3] ss:$0 sm:$0xff]  ;;  %s3558_s15 = smov [#allocation23]  }
 0x6a9   :  { %s2506_s24 = sshll.u32 %s3558_s15, 4  ;;  %s2507_s24 = int_to_ptr.vmem [resolvable:$true] %s2506_s24 }
 0x6aa   :  { %1734 = vst.msk [vmem:[#allocation25] sm:$0x3] %vm1732_vm6, %v1729_v4  ;;  %3179 = vtanh.f32 %v1729_v4  ;;  %s3453_s7 = scalar_lea.vmem %s2507_s24, 64  ;;  %p3458_p10 = scmp.lt.s32.totalorder %s2507_s24, %s2507_s24 }
 0x6ab   :  { %v1976_v31 = vpop.f32.mrb[18].mxu0  ;;  %p3454_p9 = scmp.ne.s32.totalorder %s2507_s24, %s3453_s7  ;;  %p3459_p11 = scmp.lt.s32.totalorder %s3453_s7, %s3453_s7 }
 0x6ac   :  { %v2920_v32 = vpop.f32.mrb[19].mxu0 }
 0x6ad   :  { %p3460_p12 = por %p3459_p11, %p3458_p10 }
 0x6af   :  { %p3461_p13 = pnand %p3460_p12, %p3454_p9 }
 0x6b0   :  { %v3178_v5 = vpop.eup %3177 }
 0x6b1   :  { %v1724_v6 = vadd.f32 1.0, %v3178_v5 }
 0x6b3   :  { %3181 = vrcp.f32 %v1724_v6  ;;  %v2135_v33 = vpop.f32.mrb[20].mxu0 }
 0x6b4   :  { %v3180_v10 = vpop.eup %3179  ;;  %v2942_v34 = vpop.f32.mrb[21].mxu0 }
 0x6bb   :  { %v2294_v36 = vpop.f32.mrb[22].mxu0 }
 0x6bc   :  { %v2964_v37 = vpop.f32.mrb[23].mxu0 }
 0x6bd   :  { %v3182_v11 = vpop.eup %3181 }
 0x6be   :  { %v1731_v13 = vmul.f32 %v3182_v11, %v3180_v10 }
 0x6c0   :  { %2908 = vmatmul.mubr.msk.f32.vlgmr.msra.gmra.mrb[18].mxu1 %vm241_vm1, %v1731_v13  ;;  %1733 = vst.msk [vmem:[#allocation23] sm:$0x3] %vm1732_vm6, %v1731_v13 }
 0x6c1   :  { %3097 = vmatpush3.bf16.msra.mxu1 %v3096_v12  ;;  %2929 = vmatprep.mubr.msk.f32.mxu1 %vm3554_vm0, %v3555_v9  ;;  %v1737_v12 = vld [vmem:[#allocation7 + $0x2] sm:$0x3] }
 0x6c2   :  { %3098 = vmatprep.subr.bf16.mxu1 %v3553_v3 }
 0x6c5   :  { %3100 = vmatpush3.bf16.msra.mxu1 %v3099_v17 }
 0x6c6   :  { %3107 = vmatprep.subr.bf16.mxu1 %v3553_v3 }
 0x6c8   :  { %2930 = vmatmul.mubr.msk.f32.vlgmr.msra.gmra.mrb[20].mxu1 %vm241_vm1, %v1731_v13 }
 0x6c9   :  { %3109 = vmatpush3.bf16.msra.mxu1 %v3108_v20  ;;  %2951 = vmatprep.mubr.msk.f32.mxu1 %vm3554_vm0, %v3555_v9 }
 0x6ca   :  { %3110 = vmatprep.subr.bf16.mxu1 %v3553_v3 }
 0x6cd   :  { %3112 = vmatpush3.bf16.msra.mxu1 %v3111_v23 }
 0x6ce   :  { %3119 = vmatprep.subr.bf16.mxu1 %v3553_v3 }
 0x6d0   :  { %2952 = vmatmul.mubr.msk.f32.vlgmr.msra.gmra.mrb[22].mxu1 %vm241_vm1, %v1731_v13 }
 0x6d1   :  { %3121 = vmatpush3.bf16.msra.mxu1 %v3120_v26  ;;  %2973 = vmatprep.mubr.msk.f32.mxu1 %vm3554_vm0, %v3555_v9  ;;  %v2406_v9 = vld [vmem:[%s4144_s16 + $0x8] sm:$0xff] }
 0x6d2   :  { %3122 = vmatprep.subr.bf16.mxu1 %v3553_v3  ;;  %v3126_v40 = vpack.c.bf16 %v2406_v9, %v2405_v38 }
 0x6d4   :  { %3127 = vmatpush3.bf16.msra.mxu0 %v3126_v40 }
 0x6d5   :  { %3124 = vmatpush3.bf16.msra.mxu1 %v3123_v28  ;;  %3128 = vmatprep.subr.bf16.mxu0 %v3553_v3 }
 0x6d8   :  { %2974 = vmatmul.mubr.msk.f32.vlgmr.msra.gmra.mrb[24].mxu1 %vm241_vm1, %v1731_v13  ;;  %3130 = vmatpush3.bf16.msra.mxu0 %v3129_v42 }
 0x793   :  { %v1888_v43 = vpop.f32.mrb[18].mxu1 }
 0x794   :  { %v1889_v45 = vadd.f32 %v1888_v43, %v1815_v29  ;;  %v2909_v46 = vpop.f32.mrb[19].mxu1 }
 0x796   :  { %v1899_v47 = vadd.f32 %v2574_v44, %v1889_v45 }
 0x798   :  { %v2377_v48 = vsub.f32 0.0, %v1899_v47 }
 0x79a   :  { %v2378_v49 = vmul.f32 1.442695, %v2377_v48 }
 0x79b   :  { %v2046_v50 = vpop.f32.mrb[20].mxu1 }
 0x79c   :  { %3183 = vpow2.f32 %v2378_v49  ;;  %v2047_v52 = vadd.f32 %v2046_v50, %v1976_v31  ;;  %v2931_v53 = vpop.f32.mrb[21].mxu1 }
 0x79e   :  { %v2058_v3 = vadd.f32 %v2578_v51, %v2047_v52 }
 0x7a0   :  { %v2383_v54 = vsub.f32 0.0, %v2058_v3 }
 0x7a2   :  { %v2384_v55 = vmul.f32 1.442695, %v2383_v54 }
 0x7a3   :  { %v2205_v35 = vpop.f32.mrb[22].mxu1 }
 0x7a4   :  { %3185 = vpow2.f32 %v2384_v55  ;;  %v2206_v57 = vadd.f32 %v2205_v35, %v2135_v33  ;;  %v2953_v58 = vpop.f32.mrb[23].mxu1 }
 0x7a6   :  { %v3184_v59 = vpop.eup %3183  ;;  %v2217_v60 = vadd.f32 %v2582_v56, %v2206_v57 }
 0x7a7   :  { %v2380_v61 = vadd.f32 1.0, %v3184_v59 }
 0x7a8   :  { %3187 = vtanh.f32 %v2217_v60 }
 0x7a9   :  { %3189 = vrcp.f32 %v2380_v61 }
 0x7ab   :  { %v2364_v62 = vpop.f32.mrb[24].mxu1 }
 0x7ac   :  { %v2365_v0 = vadd.f32 %v2364_v62, %v2294_v36  ;;  %v2975_v1 = vpop.f32.mrb[25].mxu1 }
 0x7ae   :  { %v3186_v2 = vpop.eup %3185  ;;  %v2376_v4 = vadd.f32 %v2586_v63, %v2365_v0 }
 0x7af   :  { %v2386_v5 = vadd.f32 1.0, %v3186_v2 }
 0x7b0   :  { %v2390_v6 = vsub.f32 0.0, %v2376_v4 }
 0x7b1   :  { %3191 = vrcp.f32 %v2386_v5 }
 0x7b2   :  { %v3188_v7 = vpop.eup %3187  ;;  %v2391_v8 = vmul.f32 1.442695, %v2390_v6 }
 0x7b3   :  { %v3190_v10 = vpop.eup %3189 }
 0x7b4   :  { %v2397_v11 = vmul.f32 %v3190_v10, %v3188_v7  ;;  %3193 = vpow2.f32 %v2391_v8 }
 0x7bb   :  { %v3192_v13 = vpop.eup %3191 }
 0x7bc   :  { %v2396_v14 = vmul.f32 %v3192_v13, %v1737_v12 }
 0x7be   :  { %v3194_v15 = vpop.eup %3193  ;;  %v2398_v17 = vadd.f32 %v2397_v11, %v2396_v14 }
 0x7bf   :  { %v2393_v18 = vadd.f32 1.0, %v3194_v15 }
 0x7c0   :  { %3195 = vtanh.f32 %v2398_v17  ;;  %2404 = vst.msk [vmem:[#allocation25 + $0x2] sm:$0x3] %vm1732_vm6, %v2398_v17 }
 0x7c1   :  { %3197 = vrcp.f32 %v2393_v18 }
 0x7ca   :  { %v3196_v19 = vpop.eup %3195 }
 0x7cb   :  { %v3198_v20 = vpop.eup %3197 }
 0x7cc   :  { %v2400_v21 = vmul.f32 %v3198_v20, %v3196_v19 }
 0x7ce   :  { %2985 = vmatmul.mubr.msk.f32.vlgmr.msra.gmra.mrb[24].mxu0 %vm241_vm1, %v2400_v21  ;;  %2402 = vst.msk [vmem:[#allocation23 + $0x2] sm:$0x3] %vm1732_vm6, %v2400_v21 }
 0x7cf   :  { %3464 = shalt.err (!%p3461_p13)
}
 0x7d0   :  { %s3465_s20 = scalar_lea.hbm %s4147_s19, 64 }
 0x7d1   :  { %p3466_p0 = scmp.ne.s32.totalorder %s4147_s19, %s3465_s20  ;;  %p3469_p1 = scmp.lt.u32.totalorder %s3465_s20, %s4147_s19 }
 0x7d3   :  { %p3471_p2 = pnand %p3469_p1, %p3466_p0 }
 0x7d5   :  { %3474 = shalt.err (!%p3471_p2)
}
 0x7d6   :  { %2512 = dma.vmem_to_hbm [thread:$0]  %s2507_s24, 64, %s4147_s19, [#allocation24], %s3538_s29, %s3538_s29, %s3539_s30  }
 0x7d7   :  { %s3559_s12 = smov [#allocation25]  }
 0x7d8   :  { %s2518_s2 = sshll.u32 %s3559_s12, 4  ;;  %s2519_s2 = int_to_ptr.vmem [resolvable:$true] %s2518_s2 }
 0x7d9   :  { %s3475_s0 = scalar_lea.vmem %s2519_s2, 64  ;;  %p3480_p4 = scmp.lt.s32.totalorder %s2519_s2, %s2519_s2 }
 0x7da   :  { %p3476_p3 = scmp.ne.s32.totalorder %s2519_s2, %s3475_s0  ;;  %p3481_p5 = scmp.lt.s32.totalorder %s3475_s0, %s3475_s0 }
 0x7dc   :  { %p3482_p6 = por %p3481_p5, %p3480_p4 }
 0x7de   :  { %p3483_p7 = pnand %p3482_p6, %p3476_p3 }
 0x7e0   :  { %3486 = shalt.err (!%p3483_p7)
}
 0x7e1   :  { %s4168_s13 = sld [smem:[#allocation42_spill]] }
 0x7e7   :  { %s3487_s8 = scalar_lea.hbm %s4168_s13, 64 }
 0x7e8   :  { %p3488_p8 = scmp.ne.s32.totalorder %s4168_s13, %s3487_s8  ;;  %p3491_p9 = scmp.lt.u32.totalorder %s3487_s8, %s4168_s13 }
 0x7ea   :  { %p3493_p10 = pnand %p3491_p9, %p3488_p8 }
 0x7ec   :  { %3496 = shalt.err (!%p3493_p10)
}
 0x7ed   :  { %2524 = dma.vmem_to_hbm [thread:$0]  %s2519_s2, 64, %s4168_s13, [#allocation24], %s3538_s29, %s3538_s29, %s3539_s30   ;;  %vm2489_vm7 = vcmask 123904  }
 0x7ee   :  { %s4169_s27 = sld [smem:[#allocation40_spill]]  ;;  %s3560_s6 = smov [#allocation22]  }
 0x7ef   :  { %s2497_s15 = sshll.u32 %s3560_s6, 4  ;;  %s2498_s15 = int_to_ptr.vmem [resolvable:$true] %s2497_s15 }
 0x7f0   :  { %s3497_s24 = scalar_lea.vmem %s2498_s15, 32  ;;  %p3502_p12 = scmp.lt.s32.totalorder %s2498_s15, %s2498_s15 }
 0x7f1   :  { %p3498_p11 = scmp.ne.s32.totalorder %s2498_s15, %s3497_s24  ;;  %p3503_p13 = scmp.lt.s32.totalorder %s3497_s24, %s3497_s24 }
 0x7f3   :  { %p3504_p0 = por %p3503_p13, %p3502_p12 }
 0x7f4   :  { %v2587_v22 = vld [vmem:[%s4169_s27] ss:$0 sm:$0xff] }
 0x7f5   :  { %p3505_p1 = pnand %p3504_p0, %p3498_p11 }
 0x8a1   :  { %v2485_v23 = vpop.f32.mrb[24].mxu0 }
 0x8a2   :  { %v2486_v24 = vadd.f32 %v2587_v22, %v2485_v23  ;;  %v2986_v25 = vpop.f32.mrb[25].mxu0 }
 0x8a4   :  { %2490 = vst.msk [vmem:[#allocation22] sm:$0x3] %vm2489_vm7, %v2486_v24 }
 0x8a5   :  { %3508 = shalt.err (!%p3505_p1)
}
 0x8a6   :  { %s4170_s7 = sld [smem:[#allocation41_spill]] }
 0x8ac   :  { %s3509_s10 = scalar_lea.hbm %s4170_s7, 32 }
 0x8ad   :  { %p3510_p2 = scmp.ne.s32.totalorder %s4170_s7, %s3509_s10  ;;  %p3513_p3 = scmp.lt.u32.totalorder %s3509_s10, %s4170_s7 }
 0x8af   :  { %p3515_p4 = pnand %p3513_p3, %p3510_p2 }
 0x8b1   :  { %3518 = shalt.err (!%p3515_p4)
}
 0x8b2   :  { %2500 = dma.vmem_to_hbm [thread:$0]  %s2498_s15, 32, %s4170_s7, [#allocation4]  }
 0x8b3   :  { %3533 = dma.done.wait [#allocation4], 32  }
 0x8b4   :  { %3534 = vsyncadd [#allocation4], 4294967264 }
 0x8b5   :  { %3535 = dma.done.wait [#allocation24], 128  }
 0x8b6   :  { %3536 = vsyncadd [#allocation24], 4294967168 }
 0x8b7   :  { %2534 = vsyncpa [#allocation3], 1 }
 0x8b8   :  { %2535 = vsyncpa [#allocation8], 1 }
 0x8b9   :  { %2536 = vsyncpa [#allocation11], 1 }
 0x8ba   :  { %2537 = vsyncpa [#allocation14], 1 }
 0x8bb   :  { %2538 = vsyncpa [#allocation17], 1 }
 0x8bc   :  { %2539 = vsyncpa [#allocation20], 1 }
 0x8bd   :  { %2540 = vsyncpa [#allocation4], 1 }
 0x8be   :  { %2541 = vsyncpa [#allocation24], 1 }
 0x8bf   :  { %2542 = vsyncpa [#allocation5], 1 }

</bundles_post_ra>
